<compile_context>
chip_gen: v7x
topology: tpu7x:2x2x1
jax: 0.10.0
libtpu: 0.0.40
codegen_flags: <defaults>
</compile_context>

<pallas_src>
import functools

import jax
import jax.numpy as jnp
from jax.experimental import pallas as pl
from jax.experimental.pallas import tpu as pltpu


# ------------------------------ shared activation ------------------------------

def _silu_f32(y):
    # Exact SiLU: y * sigmoid(y).  Kept exact (no approx reciprocal) so the kernel
    # matches the bf16-consistent reference tightly.  If profiling shows the EUP slot
    # saturating, 0.5*y*(1+tanh(0.5*y)) is a single-transcendental alternative.
    return y * (1.0 / (1.0 + jnp.exp(-y)))


# ------------------------------- Pallas kernel ---------------------------------

def _fused_repn_bottleneck_kernel(x_ref, w1_ref, b1_ref, w2_ref, b2_ref, mask_ref,
                                  o_ref, y1_scr, *, H, Wp, Cm, add):
    """x_ref:   (1, C1, Lflat) bf16  flattened zero-padded NCHW image (1 top / 2 bottom
                                     pad rows, 1 left/right pad col), Lflat=(H+3)*Wp
       w1_ref:  (9, Cm, C1) bf16     per-tap RepConvN weights, tap = kh*3+kw
       b1_ref:  (Cm, 1) f32
       w2_ref:  (9, C2, Cm) bf16     per-tap cv2 weights
       b2_ref:  (C2, 1) f32
       mask_ref:(1, H*Wp) f32        1.0 on real columns, 0.0 on the 2 wrap cols/row
       o_ref:   (1, C2, H*Wp) f32    extended-width output (wrapper drops 2 cols/row)
       y1_scr:  (Cm, Lflat) bf16     VMEM scratch holding the zero-padded y1 image."""
    HWext = H * Wp          # extended (wrap-around) flattened output length
    base = Wp + 1           # flat offset of the padded-image interior / center tap
    Lflat = y1_scr.shape[1]

    # Center-tap window, loaded once: used as the (1,1) conv tap AND the residual.
    x_center = x_ref[0, :, base: base + HWext]                    # (C1, HWext) bf16

    # -------- stage 1: RepConvN 3x3 (folded 1x1 + BN) as 9 accumulating matmuls ----
    acc1 = None
    for kh in range(3):
        for kw in range(3):
            off = kh * Wp + kw
            win = x_center if (kh == 1 and kw == 1) else x_ref[0, :, off: off + HWext]
            d = jnp.dot(w1_ref[kh * 3 + kw], win,
                        preferred_element_type=jnp.float32)       # (Cm, HWext) f32
            acc1 = d if acc1 is None else acc1 + d
    y1 = _silu_f32(acc1 + b1_ref[...])                            # (Cm, HWext) f32

    # Zero the 2 wrap-around columns of each output row: they land exactly on the
    # left/right zero border of the padded-y1 scratch image.
    y1 = y1 * mask_ref[...]

    # Refresh only the tiny zero borders (top pad row + bottom pad rows / tail); the
    # interior [base, base+HWext) — including the masked wrap columns — is fully
    # overwritten every grid step, so no full-scratch zero fill is needed.
    y1_scr[:, :base] = jnp.zeros((Cm, base), jnp.bfloat16)
    y1_scr[:, base + HWext:] = jnp.zeros((Cm, Lflat - base - HWext), jnp.bfloat16)
    y1_scr[:, base: base + HWext] = y1.astype(jnp.bfloat16)       # y1 never hits HBM

    # -------- stage 2: Conv(c_, c2, 3) + SiLU + residual, same per-tap scheme -------
    acc2 = None
    for kh in range(3):
        for kw in range(3):
            off = kh * Wp + kw
            win = y1_scr[:, off: off + HWext]                     # (Cm, HWext) bf16
            d = jnp.dot(w2_ref[kh * 3 + kw], win,
                        preferred_element_type=jnp.float32)       # (C2, HWext) f32
            acc2 = d if acc2 is None else acc2 + d
    y2 = _silu_f32(acc2 + b2_ref[...])

    if add:
        y2 = y2 + x_center.astype(jnp.float32)                    # residual (bf16 x)

    o_ref[0, :, :] = y2


# ---------------------------------- wrapper -------------------------------------

def rep_n_bottleneck(x_nchw, w_rep_oihw, b_rep, w2_oihw, b2, *, add=True):
    """x_nchw: (B, C1, H, W) f32.  Conv weights in OIHW (BN already folded).  NCHW out."""
    x = x_nchw.astype(jnp.float32)
    B, C1, H, W = x.shape
    Cm = w_rep_oihw.shape[0]
    C2 = w2_oihw.shape[0]
    if add:
        assert C1 == C2, "shortcut requires c1 == c2"
    Wp = W + 2
    HWext = H * Wp
    Lflat = (H + 3) * Wp      # 1 top pad row + H rows + 2 bottom pad rows, width Wp

    # Per-tap weight layout (9, Cout, Cin), bf16 once.
    def to_taps(w_oihw):
        O, I = w_oihw.shape[0], w_oihw.shape[1]
        return jnp.transpose(w_oihw, (2, 3, 0, 1)).reshape(9, O, I).astype(jnp.bfloat16)

    w1t, w2t = to_taps(w_rep_oihw), to_taps(w2_oihw)
    b1c = b_rep.reshape(Cm, 1).astype(jnp.float32)
    b2c = b2.reshape(C2, 1).astype(jnp.float32)

    # Single bf16 cast + single fused pad + flatten: one pre-kernel HBM pass over x.
    xflat = jnp.pad(x.astype(jnp.bfloat16),
                    ((0, 0), (0, 0), (1, 2), (1, 1))).reshape(B, C1, Lflat)

    # Grid-invariant wrap-column mask (computed once by XLA, ~1 KiB input).
    lane = jnp.arange(HWext, dtype=jnp.int32)
    mask = ((lane % Wp) < W).astype(jnp.float32).reshape(1, HWext)

    out_ext = pl.pallas_call(
        functools.partial(_fused_repn_bottleneck_kernel,
                          H=H, Wp=Wp, Cm=Cm, add=add),
        out_shape=jax.ShapeDtypeStruct((B, C2, HWext), jnp.float32),
        grid_spec=pltpu.PrefetchScalarGridSpec(
            num_scalar_prefetch=0,
            grid=(B,),
            in_specs=[
                pl.BlockSpec((1, C1, Lflat), lambda b: (b, 0, 0)),
                pl.BlockSpec((9, Cm, C1), lambda b: (0, 0, 0)),
                pl.BlockSpec((Cm, 1), lambda b: (0, 0)),
                pl.BlockSpec((9, C2, Cm), lambda b: (0, 0, 0)),
                pl.BlockSpec((C2, 1), lambda b: (0, 0)),
                pl.BlockSpec((1, HWext), lambda b: (0, 0)),
            ],
            out_specs=pl.BlockSpec((1, C2, HWext), lambda b: (b, 0, 0)),
            scratch_shapes=[pltpu.VMEM((Cm, Lflat), jnp.bfloat16)],
        ),
        compiler_params=pltpu.CompilerParams(
            dimension_semantics=("parallel",),          # shard batch over v7x's 2 TCs
            vmem_limit_bytes=48 * 1024 * 1024),         # headroom on v7x; raise on v5e/v6e
    )(xflat, w1t, b1c, w2t, b2c, mask)

    # Drop the 2 over-computed wrap-around columns per row (already NCHW).
    # TODO(synk): at large feature maps fuse this column drop into the consumer (or
    # keep the (H, Wp) extended layout downstream) to avoid an extra HBM pass.
    return out_ext.reshape(B, C2, H, Wp)[:, :, :, :W]


# -------------------------- deterministic param setup ----------------------------

def _fold_bn(w_oihw, gamma, beta, mean, var, eps=1e-3):
    """Fold eval-mode BatchNorm into the preceding (bias-free) conv."""
    scale = gamma / jnp.sqrt(var + eps)
    return w_oihw * scale[:, None, None, None], beta - mean * scale


def make_params(key, c1, c2, e=0.5):
    c_ = int(c2 * e)
    ks = jax.random.split(key, 15)

    def bn_params(k0, k1, k2, k3, c):
        gamma = 1.0 + 0.1 * jax.random.normal(k0, (c,), jnp.float32)
        beta = 0.1 * jax.random.normal(k1, (c,), jnp.float32)
        mean = 0.1 * jax.random.normal(k2, (c,), jnp.float32)
        var = 1.0 + 0.2 * jax.random.uniform(k3, (c,), jnp.float32)
        return gamma, beta, mean, var

    # RepConvN branches: conv1 = 3x3, conv2 = 1x1 (each Conv2d + BN, no act)
    w3 = 0.3 * jax.random.normal(ks[0], (c_, c1, 3, 3), jnp.float32)
    w1 = 0.3 * jax.random.normal(ks[1], (c_, c1, 1, 1), jnp.float32)
    w3f, b3f = _fold_bn(w3, *bn_params(ks[2], ks[3], ks[4], ks[5], c_))
    w1f, b1f = _fold_bn(w1, *bn_params(ks[6], ks[7], ks[8], ks[9], c_))
    w_rep_oihw = w3f + jnp.pad(w1f, ((0, 0), (0, 0), (1, 1), (1, 1)))
    b_rep = b3f + b1f

    # cv2 = Conv(c_, c2, 3): Conv2d + BN + SiLU
    w2 = 0.3 * jax.random.normal(ks[10], (c2, c_, 3, 3), jnp.float32)
    w2f, b2f = _fold_bn(w2, *bn_params(ks[11], ks[12], ks[13], ks[14], c2))
    return w_rep_oihw, b_rep, w2f, b2f


# ----------------------------------- reference -----------------------------------

def ref_forward(x, w1_oihw, b1, w2_oihw, b2, *, add=True, cast_bf16=False):
    """f32 reference; cast_bf16=True mirrors the kernel's bf16-matmul / f32-accum path
    (including the bf16-rounded residual, since the kernel's x input is bf16)."""
    def conv(inp, w, b):
        if cast_bf16:
            inp, w = inp.astype(jnp.bfloat16), w.astype(jnp.bfloat16)
        y = jax.lax.conv_general_dilated(
            inp, w, window_strides=(1, 1), padding=((1, 1), (1, 1)),
            dimension_numbers=("NCHW", "OIHW", "NCHW"),
            preferred_element_type=jnp.float32)
        return y + b[None, :, None, None]

    y1 = _silu_f32(conv(x, w1_oihw, b1))
    if cast_bf16:
        y1 = y1.astype(jnp.bfloat16).astype(jnp.float32)
    y2 = _silu_f32(conv(y1, w2_oihw, b2))
    if not add:
        return y2
    xr = x.astype(jnp.bfloat16).astype(jnp.float32) if cast_bf16 else x
    return xr + y2


# ------------------------------------- main ---------------------------------------

if __name__ == "__main__":
    B, C1, C2, H, W = 2, 4, 4, 16, 16   # shortcut active since C1 == C2
    key = jax.random.PRNGKey(0)
    kx, kp = jax.random.split(key)

    x = jax.random.normal(kx, (B, C1, H, W), jnp.float32)
    w_rep, b_rep, w2, b2 = make_params(kp, C1, C2, e=0.5)

    fwd = jax.jit(functools.partial(rep_n_bottleneck, add=True))
    out = jax.block_until_ready(fwd(x, w_rep, b_rep, w2, b2))

    ref_bf16 = ref_forward(x, w_rep, b_rep, w2, b2, add=True, cast_bf16=True)
    ref_f32 = ref_forward(x, w_rep, b_rep, w2, b2, add=True, cast_bf16=False)

    assert out.shape == (B, C2, H, W)
    err_bf16 = float(jnp.max(jnp.abs(out - ref_bf16)))   # same bf16 path -> tight
    err_f32 = float(jnp.max(jnp.abs(out - ref_f32)))     # bf16 vs f32 math -> loose
    assert err_bf16 < 3e-2, f"mismatch vs bf16-consistent reference: {err_bf16}"
    assert err_f32 < 2.5e-1, f"mismatch vs f32 reference: {err_f32}"

    print("KERNEL_OK")
</pallas_src>

<mosaic_0001>
module attributes {stable_mosaic.version = 11 : i64} {
  func.func @_fused_repn_bottleneck_kernel(%arg0: i32, %arg1: memref<1x4x342xbf16, #tpu.memory_space<vmem>>, %arg2: memref<9x2x4xbf16, #tpu.memory_space<vmem>>, %arg3: memref<2x1xf32, #tpu.memory_space<vmem>>, %arg4: memref<9x4x2xbf16, #tpu.memory_space<vmem>>, %arg5: memref<4x1xf32, #tpu.memory_space<vmem>>, %arg6: memref<1x288xf32, #tpu.memory_space<vmem>>, %arg7: memref<1x4x288xf32, #tpu.memory_space<vmem>>, %arg8: memref<2x342xbf16, #tpu.memory_space<vmem>>) attributes {dimension_semantics = [#tpu.dimension_semantics<parallel>], iteration_bounds = array<i64: 2>, scalar_prefetch = 0 : i64, scratch_operands = 1 : i64, tpu.core_type = #tpu.core_type<tc>, window_params = [{transform_indices = @transform_0, window_bounds = array<i64: 1, 4, 342>}, {pipeline_mode = #tpu.pipeline_mode<synchronous>, transform_indices = @transform_1, window_bounds = array<i64: 9, 2, 4>}, {pipeline_mode = #tpu.pipeline_mode<synchronous>, transform_indices = @transform_2, window_bounds = array<i64: 2, 1>}, {pipeline_mode = #tpu.pipeline_mode<synchronous>, transform_indices = @transform_3, window_bounds = array<i64: 9, 4, 2>}, {pipeline_mode = #tpu.pipeline_mode<synchronous>, transform_indices = @transform_4, window_bounds = array<i64: 4, 1>}, {pipeline_mode = #tpu.pipeline_mode<synchronous>, transform_indices = @transform_5, window_bounds = array<i64: 1, 288>}, {transform_indices = @transform_6, window_bounds = array<i64: 1, 4, 288>}]} {
    %c0 = arith.constant 0 : index
    %c0_0 = arith.constant 0 : index
    %c19 = arith.constant 19 : index
    %0 = vector.load %arg1[%c0, %c0_0, %c19] : memref<1x4x342xbf16, #tpu.memory_space<vmem>>, vector<1x4x288xbf16>
    %1 = vector.shape_cast %0 : vector<1x4x288xbf16> to vector<4x288xbf16>
    %c0_1 = arith.constant 0 : index
    %c0_2 = arith.constant 0 : index
    %c0_3 = arith.constant 0 : index
    %2 = vector.load %arg1[%c0_1, %c0_2, %c0_3] : memref<1x4x342xbf16, #tpu.memory_space<vmem>>, vector<1x4x288xbf16>
    %3 = vector.shape_cast %2 : vector<1x4x288xbf16> to vector<4x288xbf16>
    %c0_4 = arith.constant 0 : index
    %c0_5 = arith.constant 0 : index
    %c0_6 = arith.constant 0 : index
    %4 = vector.load %arg2[%c0_4, %c0_5, %c0_6] : memref<9x2x4xbf16, #tpu.memory_space<vmem>>, vector<1x2x4xbf16>
    %5 = vector.shape_cast %4 : vector<1x2x4xbf16> to vector<2x4xbf16>
    %cst = arith.constant dense<0.000000e+00> : vector<2x288xf32>
    %6 = tpu.matmul %5, %3, %cst {dimension_numbers = #tpu.dot_dimension_numbers<[1], [0], [0], [1], [0, 0, 1, 1], [], []>} : vector<2x4xbf16>, vector<4x288xbf16>, vector<2x288xf32> -> vector<2x288xf32>
    %c0_7 = arith.constant 0 : index
    %c0_8 = arith.constant 0 : index
    %c1 = arith.constant 1 : index
    %7 = vector.load %arg1[%c0_7, %c0_8, %c1] : memref<1x4x342xbf16, #tpu.memory_space<vmem>>, vector<1x4x288xbf16>
    %8 = vector.shape_cast %7 : vector<1x4x288xbf16> to vector<4x288xbf16>
    %c1_9 = arith.constant 1 : index
    %c0_10 = arith.constant 0 : index
    %c0_11 = arith.constant 0 : index
    %9 = vector.load %arg2[%c1_9, %c0_10, %c0_11] : memref<9x2x4xbf16, #tpu.memory_space<vmem>>, vector<1x2x4xbf16>
    %10 = vector.shape_cast %9 : vector<1x2x4xbf16> to vector<2x4xbf16>
    %cst_12 = arith.constant dense<0.000000e+00> : vector<2x288xf32>
    %11 = tpu.matmul %10, %8, %cst_12 {dimension_numbers = #tpu.dot_dimension_numbers<[1], [0], [0], [1], [0, 0, 1, 1], [], []>} : vector<2x4xbf16>, vector<4x288xbf16>, vector<2x288xf32> -> vector<2x288xf32>
    %12 = arith.addf %6, %11 : vector<2x288xf32>
    %c0_13 = arith.constant 0 : index
    %c0_14 = arith.constant 0 : index
    %c2 = arith.constant 2 : index
    %13 = vector.load %arg1[%c0_13, %c0_14, %c2] : memref<1x4x342xbf16, #tpu.memory_space<vmem>>, vector<1x4x288xbf16>
    %14 = vector.shape_cast %13 : vector<1x4x288xbf16> to vector<4x288xbf16>
    %c2_15 = arith.constant 2 : index
    %c0_16 = arith.constant 0 : index
    %c0_17 = arith.constant 0 : index
    %15 = vector.load %arg2[%c2_15, %c0_16, %c0_17] : memref<9x2x4xbf16, #tpu.memory_space<vmem>>, vector<1x2x4xbf16>
    %16 = vector.shape_cast %15 : vector<1x2x4xbf16> to vector<2x4xbf16>
    %cst_18 = arith.constant dense<0.000000e+00> : vector<2x288xf32>
    %17 = tpu.matmul %16, %14, %cst_18 {dimension_numbers = #tpu.dot_dimension_numbers<[1], [0], [0], [1], [0, 0, 1, 1], [], []>} : vector<2x4xbf16>, vector<4x288xbf16>, vector<2x288xf32> -> vector<2x288xf32>
    %18 = arith.addf %12, %17 : vector<2x288xf32>
    %c0_19 = arith.constant 0 : index
    %c0_20 = arith.constant 0 : index
    %c18 = arith.constant 18 : index
    %19 = vector.load %arg1[%c0_19, %c0_20, %c18] : memref<1x4x342xbf16, #tpu.memory_space<vmem>>, vector<1x4x288xbf16>
    %20 = vector.shape_cast %19 : vector<1x4x288xbf16> to vector<4x288xbf16>
    %c3 = arith.constant 3 : index
    %c0_21 = arith.constant 0 : index
    %c0_22 = arith.constant 0 : index
    %21 = vector.load %arg2[%c3, %c0_21, %c0_22] : memref<9x2x4xbf16, #tpu.memory_space<vmem>>, vector<1x2x4xbf16>
    %22 = vector.shape_cast %21 : vector<1x2x4xbf16> to vector<2x4xbf16>
    %cst_23 = arith.constant dense<0.000000e+00> : vector<2x288xf32>
    %23 = tpu.matmul %22, %20, %cst_23 {dimension_numbers = #tpu.dot_dimension_numbers<[1], [0], [0], [1], [0, 0, 1, 1], [], []>} : vector<2x4xbf16>, vector<4x288xbf16>, vector<2x288xf32> -> vector<2x288xf32>
    %24 = arith.addf %18, %23 : vector<2x288xf32>
    %c4 = arith.constant 4 : index
    %c0_24 = arith.constant 0 : index
    %c0_25 = arith.constant 0 : index
    %25 = vector.load %arg2[%c4, %c0_24, %c0_25] : memref<9x2x4xbf16, #tpu.memory_space<vmem>>, vector<1x2x4xbf16>
    %26 = vector.shape_cast %25 : vector<1x2x4xbf16> to vector<2x4xbf16>
    %cst_26 = arith.constant dense<0.000000e+00> : vector<2x288xf32>
    %27 = tpu.matmul %26, %1, %cst_26 {dimension_numbers = #tpu.dot_dimension_numbers<[1], [0], [0], [1], [0, 0, 1, 1], [], []>} : vector<2x4xbf16>, vector<4x288xbf16>, vector<2x288xf32> -> vector<2x288xf32>
    %28 = arith.addf %24, %27 : vector<2x288xf32>
    %c0_27 = arith.constant 0 : index
    %c0_28 = arith.constant 0 : index
    %c20 = arith.constant 20 : index
    %29 = vector.load %arg1[%c0_27, %c0_28, %c20] : memref<1x4x342xbf16, #tpu.memory_space<vmem>>, vector<1x4x288xbf16>
    %30 = vector.shape_cast %29 : vector<1x4x288xbf16> to vector<4x288xbf16>
    %c5 = arith.constant 5 : index
    %c0_29 = arith.constant 0 : index
    %c0_30 = arith.constant 0 : index
    %31 = vector.load %arg2[%c5, %c0_29, %c0_30] : memref<9x2x4xbf16, #tpu.memory_space<vmem>>, vector<1x2x4xbf16>
    %32 = vector.shape_cast %31 : vector<1x2x4xbf16> to vector<2x4xbf16>
    %cst_31 = arith.constant dense<0.000000e+00> : vector<2x288xf32>
    %33 = tpu.matmul %32, %30, %cst_31 {dimension_numbers = #tpu.dot_dimension_numbers<[1], [0], [0], [1], [0, 0, 1, 1], [], []>} : vector<2x4xbf16>, vector<4x288xbf16>, vector<2x288xf32> -> vector<2x288xf32>
    %34 = arith.addf %28, %33 : vector<2x288xf32>
    %c0_32 = arith.constant 0 : index
    %c0_33 = arith.constant 0 : index
    %c36 = arith.constant 36 : index
    %35 = vector.load %arg1[%c0_32, %c0_33, %c36] : memref<1x4x342xbf16, #tpu.memory_space<vmem>>, vector<1x4x288xbf16>
    %36 = vector.shape_cast %35 : vector<1x4x288xbf16> to vector<4x288xbf16>
    %c6 = arith.constant 6 : index
    %c0_34 = arith.constant 0 : index
    %c0_35 = arith.constant 0 : index
    %37 = vector.load %arg2[%c6, %c0_34, %c0_35] : memref<9x2x4xbf16, #tpu.memory_space<vmem>>, vector<1x2x4xbf16>
    %38 = vector.shape_cast %37 : vector<1x2x4xbf16> to vector<2x4xbf16>
    %cst_36 = arith.constant dense<0.000000e+00> : vector<2x288xf32>
    %39 = tpu.matmul %38, %36, %cst_36 {dimension_numbers = #tpu.dot_dimension_numbers<[1], [0], [0], [1], [0, 0, 1, 1], [], []>} : vector<2x4xbf16>, vector<4x288xbf16>, vector<2x288xf32> -> vector<2x288xf32>
    %40 = arith.addf %34, %39 : vector<2x288xf32>
    %c0_37 = arith.constant 0 : index
    %c0_38 = arith.constant 0 : index
    %c37 = arith.constant 37 : index
    %41 = vector.load %arg1[%c0_37, %c0_38, %c37] : memref<1x4x342xbf16, #tpu.memory_space<vmem>>, vector<1x4x288xbf16>
    %42 = vector.shape_cast %41 : vector<1x4x288xbf16> to vector<4x288xbf16>
    %c7 = arith.constant 7 : index
    %c0_39 = arith.constant 0 : index
    %c0_40 = arith.constant 0 : index
    %43 = vector.load %arg2[%c7, %c0_39, %c0_40] : memref<9x2x4xbf16, #tpu.memory_space<vmem>>, vector<1x2x4xbf16>
    %44 = vector.shape_cast %43 : vector<1x2x4xbf16> to vector<2x4xbf16>
    %cst_41 = arith.constant dense<0.000000e+00> : vector<2x288xf32>
    %45 = tpu.matmul %44, %42, %cst_41 {dimension_numbers = #tpu.dot_dimension_numbers<[1], [0], [0], [1], [0, 0, 1, 1], [], []>} : vector<2x4xbf16>, vector<4x288xbf16>, vector<2x288xf32> -> vector<2x288xf32>
    %46 = arith.addf %40, %45 : vector<2x288xf32>
    %c0_42 = arith.constant 0 : index
    %c0_43 = arith.constant 0 : index
    %c38 = arith.constant 38 : index
    %47 = vector.load %arg1[%c0_42, %c0_43, %c38] : memref<1x4x342xbf16, #tpu.memory_space<vmem>>, vector<1x4x288xbf16>
    %48 = vector.shape_cast %47 : vector<1x4x288xbf16> to vector<4x288xbf16>
    %c8 = arith.constant 8 : index
    %c0_44 = arith.constant 0 : index
    %c0_45 = arith.constant 0 : index
    %49 = vector.load %arg2[%c8, %c0_44, %c0_45] : memref<9x2x4xbf16, #tpu.memory_space<vmem>>, vector<1x2x4xbf16>
    %50 = vector.shape_cast %49 : vector<1x2x4xbf16> to vector<2x4xbf16>
    %cst_46 = arith.constant dense<0.000000e+00> : vector<2x288xf32>
    %51 = tpu.matmul %50, %48, %cst_46 {dimension_numbers = #tpu.dot_dimension_numbers<[1], [0], [0], [1], [0, 0, 1, 1], [], []>} : vector<2x4xbf16>, vector<4x288xbf16>, vector<2x288xf32> -> vector<2x288xf32>
    %52 = arith.addf %46, %51 : vector<2x288xf32>
    %c0_47 = arith.constant 0 : index
    %c0_48 = arith.constant 0 : index
    %53 = vector.load %arg3[%c0_47, %c0_48] : memref<2x1xf32, #tpu.memory_space<vmem>>, vector<2x1xf32>
    %54 = vector.broadcast %53 : vector<2x1xf32> to vector<2x288xf32>
    %55 = arith.addf %52, %54 : vector<2x288xf32>
    %cst_49 = arith.constant 0.000000e+00 : f32
    %56 = vector.broadcast %cst_49 : f32 to vector<2x288xf32>
    %57 = arith.subf %56, %55 : vector<2x288xf32>
    %58 = math.exp %57 : vector<2x288xf32>
    %cst_50 = arith.constant 1.000000e+00 : f32
    %59 = vector.broadcast %cst_50 : f32 to vector<2x288xf32>
    %60 = arith.addf %59, %58 : vector<2x288xf32>
    %cst_51 = arith.constant 1.000000e+00 : f32
    %61 = vector.broadcast %cst_51 : f32 to vector<2x288xf32>
    %62 = arith.divf %61, %60 : vector<2x288xf32>
    %63 = arith.mulf %55, %62 : vector<2x288xf32>
    %c0_52 = arith.constant 0 : index
    %c0_53 = arith.constant 0 : index
    %64 = vector.load %arg6[%c0_52, %c0_53] : memref<1x288xf32, #tpu.memory_space<vmem>>, vector<1x288xf32>
    %65 = vector.broadcast %64 : vector<1x288xf32> to vector<2x288xf32>
    %66 = arith.mulf %63, %65 : vector<2x288xf32>
    %cst_54 = arith.constant 0.000000e+00 : bf16
    %67 = vector.broadcast %cst_54 : bf16 to vector<2x19xbf16>
    %c0_55 = arith.constant 0 : index
    %c0_56 = arith.constant 0 : index
    %68 = vector.load %arg8[%c0_55, %c0_56] : memref<2x342xbf16, #tpu.memory_space<vmem>>, vector<2x19xbf16>
    tpu.vector_store %arg8[%c0_55, %c0_56], %67 {strides = array<i32>} : memref<2x342xbf16, #tpu.memory_space<vmem>>, vector<2x19xbf16>,
    %cst_57 = arith.constant 0.000000e+00 : bf16
    %69 = vector.broadcast %cst_57 : bf16 to vector<2x35xbf16>
    %c0_58 = arith.constant 0 : index
    %c307 = arith.constant 307 : index
    %70 = vector.load %arg8[%c0_58, %c307] : memref<2x342xbf16, #tpu.memory_space<vmem>>, vector<2x35xbf16>
    tpu.vector_store %arg8[%c0_58, %c307], %69 {strides = array<i32>} : memref<2x342xbf16, #tpu.memory_space<vmem>>, vector<2x35xbf16>,
    %71 = arith.truncf %66 : vector<2x288xf32> to vector<2x288xbf16>
    %c0_59 = arith.constant 0 : index
    %c19_60 = arith.constant 19 : index
    %72 = vector.load %arg8[%c0_59, %c19_60] : memref<2x342xbf16, #tpu.memory_space<vmem>>, vector<2x288xbf16>
    tpu.vector_store %arg8[%c0_59, %c19_60], %71 {strides = array<i32>} : memref<2x342xbf16, #tpu.memory_space<vmem>>, vector<2x288xbf16>,
    %c0_61 = arith.constant 0 : index
    %c0_62 = arith.constant 0 : index
    %73 = vector.load %arg8[%c0_61, %c0_62] : memref<2x342xbf16, #tpu.memory_space<vmem>>, vector<2x288xbf16>
    %c0_63 = arith.constant 0 : index
    %c0_64 = arith.constant 0 : index
    %c0_65 = arith.constant 0 : index
    %74 = vector.load %arg4[%c0_63, %c0_64, %c0_65] : memref<9x4x2xbf16, #tpu.memory_space<vmem>>, vector<1x4x2xbf16>
    %75 = vector.shape_cast %74 : vector<1x4x2xbf16> to vector<4x2xbf16>
    %cst_66 = arith.constant dense<0.000000e+00> : vector<4x288xf32>
    %76 = tpu.matmul %75, %73, %cst_66 {dimension_numbers = #tpu.dot_dimension_numbers<[1], [0], [0], [1], [0, 0, 1, 1], [], []>} : vector<4x2xbf16>, vector<2x288xbf16>, vector<4x288xf32> -> vector<4x288xf32>
    %c0_67 = arith.constant 0 : index
    %c1_68 = arith.constant 1 : index
    %77 = vector.load %arg8[%c0_67, %c1_68] : memref<2x342xbf16, #tpu.memory_space<vmem>>, vector<2x288xbf16>
    %c1_69 = arith.constant 1 : index
    %c0_70 = arith.constant 0 : index
    %c0_71 = arith.constant 0 : index
    %78 = vector.load %arg4[%c1_69, %c0_70, %c0_71] : memref<9x4x2xbf16, #tpu.memory_space<vmem>>, vector<1x4x2xbf16>
    %79 = vector.shape_cast %78 : vector<1x4x2xbf16> to vector<4x2xbf16>
    %cst_72 = arith.constant dense<0.000000e+00> : vector<4x288xf32>
    %80 = tpu.matmul %79, %77, %cst_72 {dimension_numbers = #tpu.dot_dimension_numbers<[1], [0], [0], [1], [0, 0, 1, 1], [], []>} : vector<4x2xbf16>, vector<2x288xbf16>, vector<4x288xf32> -> vector<4x288xf32>
    %81 = arith.addf %76, %80 : vector<4x288xf32>
    %c0_73 = arith.constant 0 : index
    %c2_74 = arith.constant 2 : index
    %82 = vector.load %arg8[%c0_73, %c2_74] : memref<2x342xbf16, #tpu.memory_space<vmem>>, vector<2x288xbf16>
    %c2_75 = arith.constant 2 : index
    %c0_76 = arith.constant 0 : index
    %c0_77 = arith.constant 0 : index
    %83 = vector.load %arg4[%c2_75, %c0_76, %c0_77] : memref<9x4x2xbf16, #tpu.memory_space<vmem>>, vector<1x4x2xbf16>
    %84 = vector.shape_cast %83 : vector<1x4x2xbf16> to vector<4x2xbf16>
    %cst_78 = arith.constant dense<0.000000e+00> : vector<4x288xf32>
    %85 = tpu.matmul %84, %82, %cst_78 {dimension_numbers = #tpu.dot_dimension_numbers<[1], [0], [0], [1], [0, 0, 1, 1], [], []>} : vector<4x2xbf16>, vector<2x288xbf16>, vector<4x288xf32> -> vector<4x288xf32>
    %86 = arith.addf %81, %85 : vector<4x288xf32>
    %c0_79 = arith.constant 0 : index
    %c18_80 = arith.constant 18 : index
    %87 = vector.load %arg8[%c0_79, %c18_80] : memref<2x342xbf16, #tpu.memory_space<vmem>>, vector<2x288xbf16>
    %c3_81 = arith.constant 3 : index
    %c0_82 = arith.constant 0 : index
    %c0_83 = arith.constant 0 : index
    %88 = vector.load %arg4[%c3_81, %c0_82, %c0_83] : memref<9x4x2xbf16, #tpu.memory_space<vmem>>, vector<1x4x2xbf16>
    %89 = vector.shape_cast %88 : vector<1x4x2xbf16> to vector<4x2xbf16>
    %cst_84 = arith.constant dense<0.000000e+00> : vector<4x288xf32>
    %90 = tpu.matmul %89, %87, %cst_84 {dimension_numbers = #tpu.dot_dimension_numbers<[1], [0], [0], [1], [0, 0, 1, 1], [], []>} : vector<4x2xbf16>, vector<2x288xbf16>, vector<4x288xf32> -> vector<4x288xf32>
    %91 = arith.addf %86, %90 : vector<4x288xf32>
    %c0_85 = arith.constant 0 : index
    %c19_86 = arith.constant 19 : index
    %92 = vector.load %arg8[%c0_85, %c19_86] : memref<2x342xbf16, #tpu.memory_space<vmem>>, vector<2x288xbf16>
    %c4_87 = arith.constant 4 : index
    %c0_88 = arith.constant 0 : index
    %c0_89 = arith.constant 0 : index
    %93 = vector.load %arg4[%c4_87, %c0_88, %c0_89] : memref<9x4x2xbf16, #tpu.memory_space<vmem>>, vector<1x4x2xbf16>
    %94 = vector.shape_cast %93 : vector<1x4x2xbf16> to vector<4x2xbf16>
    %cst_90 = arith.constant dense<0.000000e+00> : vector<4x288xf32>
    %95 = tpu.matmul %94, %92, %cst_90 {dimension_numbers = #tpu.dot_dimension_numbers<[1], [0], [0], [1], [0, 0, 1, 1], [], []>} : vector<4x2xbf16>, vector<2x288xbf16>, vector<4x288xf32> -> vector<4x288xf32>
    %96 = arith.addf %91, %95 : vector<4x288xf32>
    %c0_91 = arith.constant 0 : index
    %c20_92 = arith.constant 20 : index
    %97 = vector.load %arg8[%c0_91, %c20_92] : memref<2x342xbf16, #tpu.memory_space<vmem>>, vector<2x288xbf16>
    %c5_93 = arith.constant 5 : index
    %c0_94 = arith.constant 0 : index
    %c0_95 = arith.constant 0 : index
    %98 = vector.load %arg4[%c5_93, %c0_94, %c0_95] : memref<9x4x2xbf16, #tpu.memory_space<vmem>>, vector<1x4x2xbf16>
    %99 = vector.shape_cast %98 : vector<1x4x2xbf16> to vector<4x2xbf16>
    %cst_96 = arith.constant dense<0.000000e+00> : vector<4x288xf32>
    %100 = tpu.matmul %99, %97, %cst_96 {dimension_numbers = #tpu.dot_dimension_numbers<[1], [0], [0], [1], [0, 0, 1, 1], [], []>} : vector<4x2xbf16>, vector<2x288xbf16>, vector<4x288xf32> -> vector<4x288xf32>
    %101 = arith.addf %96, %100 : vector<4x288xf32>
    %c0_97 = arith.constant 0 : index
    %c36_98 = arith.constant 36 : index
    %102 = vector.load %arg8[%c0_97, %c36_98] : memref<2x342xbf16, #tpu.memory_space<vmem>>, vector<2x288xbf16>
    %c6_99 = arith.constant 6 : index
    %c0_100 = arith.constant 0 : index
    %c0_101 = arith.constant 0 : index
    %103 = vector.load %arg4[%c6_99, %c0_100, %c0_101] : memref<9x4x2xbf16, #tpu.memory_space<vmem>>, vector<1x4x2xbf16>
    %104 = vector.shape_cast %103 : vector<1x4x2xbf16> to vector<4x2xbf16>
    %cst_102 = arith.constant dense<0.000000e+00> : vector<4x288xf32>
    %105 = tpu.matmul %104, %102, %cst_102 {dimension_numbers = #tpu.dot_dimension_numbers<[1], [0], [0], [1], [0, 0, 1, 1], [], []>} : vector<4x2xbf16>, vector<2x288xbf16>, vector<4x288xf32> -> vector<4x288xf32>
    %106 = arith.addf %101, %105 : vector<4x288xf32>
    %c0_103 = arith.constant 0 : index
    %c37_104 = arith.constant 37 : index
    %107 = vector.load %arg8[%c0_103, %c37_104] : memref<2x342xbf16, #tpu.memory_space<vmem>>, vector<2x288xbf16>
    %c7_105 = arith.constant 7 : index
    %c0_106 = arith.constant 0 : index
    %c0_107 = arith.constant 0 : index
    %108 = vector.load %arg4[%c7_105, %c0_106, %c0_107] : memref<9x4x2xbf16, #tpu.memory_space<vmem>>, vector<1x4x2xbf16>
    %109 = vector.shape_cast %108 : vector<1x4x2xbf16> to vector<4x2xbf16>
    %cst_108 = arith.constant dense<0.000000e+00> : vector<4x288xf32>
    %110 = tpu.matmul %109, %107, %cst_108 {dimension_numbers = #tpu.dot_dimension_numbers<[1], [0], [0], [1], [0, 0, 1, 1], [], []>} : vector<4x2xbf16>, vector<2x288xbf16>, vector<4x288xf32> -> vector<4x288xf32>
    %111 = arith.addf %106, %110 : vector<4x288xf32>
    %c0_109 = arith.constant 0 : index
    %c38_110 = arith.constant 38 : index
    %112 = vector.load %arg8[%c0_109, %c38_110] : memref<2x342xbf16, #tpu.memory_space<vmem>>, vector<2x288xbf16>
    %c8_111 = arith.constant 8 : index
    %c0_112 = arith.constant 0 : index
    %c0_113 = arith.constant 0 : index
    %113 = vector.load %arg4[%c8_111, %c0_112, %c0_113] : memref<9x4x2xbf16, #tpu.memory_space<vmem>>, vector<1x4x2xbf16>
    %114 = vector.shape_cast %113 : vector<1x4x2xbf16> to vector<4x2xbf16>
    %cst_114 = arith.constant dense<0.000000e+00> : vector<4x288xf32>
    %115 = tpu.matmul %114, %112, %cst_114 {dimension_numbers = #tpu.dot_dimension_numbers<[1], [0], [0], [1], [0, 0, 1, 1], [], []>} : vector<4x2xbf16>, vector<2x288xbf16>, vector<4x288xf32> -> vector<4x288xf32>
    %116 = arith.addf %111, %115 : vector<4x288xf32>
    %c0_115 = arith.constant 0 : index
    %c0_116 = arith.constant 0 : index
    %117 = vector.load %arg5[%c0_115, %c0_116] : memref<4x1xf32, #tpu.memory_space<vmem>>, vector<4x1xf32>
    %118 = vector.broadcast %117 : vector<4x1xf32> to vector<4x288xf32>
    %119 = arith.addf %116, %118 : vector<4x288xf32>
    %cst_117 = arith.constant 0.000000e+00 : f32
    %120 = vector.broadcast %cst_117 : f32 to vector<4x288xf32>
    %121 = arith.subf %120, %119 : vector<4x288xf32>
    %122 = math.exp %121 : vector<4x288xf32>
    %cst_118 = arith.constant 1.000000e+00 : f32
    %123 = vector.broadcast %cst_118 : f32 to vector<4x288xf32>
    %124 = arith.addf %123, %122 : vector<4x288xf32>
    %cst_119 = arith.constant 1.000000e+00 : f32
    %125 = vector.broadcast %cst_119 : f32 to vector<4x288xf32>
    %126 = arith.divf %125, %124 : vector<4x288xf32>
    %127 = arith.mulf %119, %126 : vector<4x288xf32>
    %128 = arith.extf %1 : vector<4x288xbf16> to vector<4x288xf32>
    %129 = arith.addf %127, %128 : vector<4x288xf32>
    %c0_120 = arith.constant 0 : index
    %c0_121 = arith.constant 0 : index
    %c0_122 = arith.constant 0 : index
    %130 = vector.load %arg7[%c0_120, %c0_121, %c0_122] : memref<1x4x288xf32, #tpu.memory_space<vmem>>, vector<1x4x288xf32>
    %131 = vector.shape_cast %130 : vector<1x4x288xf32> to vector<4x288xf32>
    %132 = vector.shape_cast %129 : vector<4x288xf32> to vector<1x4x288xf32>
    tpu.vector_store %arg7[%c0_120, %c0_121, %c0_122], %132 {strides = array<i32>} : memref<1x4x288xf32, #tpu.memory_space<vmem>>, vector<1x4x288xf32>,
    return
  }
  func.func @transform_0(%arg0: i32) -> (i32, i32, i32) {
    %c0_i32 = arith.constant 0 : i32
    %c0_i32_0 = arith.constant 0 : i32
    %c0_i32_1 = arith.constant 0 : i32
    return %arg0, %c0_i32, %c0_i32_0 : i32, i32, i32
  }
  func.func @transform_1(%arg0: i32) -> (i32, i32, i32) {
    %c0_i32 = arith.constant 0 : i32
    %c0_i32_0 = arith.constant 0 : i32
    %c0_i32_1 = arith.constant 0 : i32
    %c0_i32_2 = arith.constant 0 : i32
    return %c0_i32, %c0_i32_0, %c0_i32_1 : i32, i32, i32
  }
  func.func @transform_2(%arg0: i32) -> (i32, i32) {
    %c0_i32 = arith.constant 0 : i32
    %c0_i32_0 = arith.constant 0 : i32
    %c0_i32_1 = arith.constant 0 : i32
    return %c0_i32, %c0_i32_0 : i32, i32
  }
  func.func @transform_3(%arg0: i32) -> (i32, i32, i32) {
    %c0_i32 = arith.constant 0 : i32
    %c0_i32_0 = arith.constant 0 : i32
    %c0_i32_1 = arith.constant 0 : i32
    %c0_i32_2 = arith.constant 0 : i32
    return %c0_i32, %c0_i32_0, %c0_i32_1 : i32, i32, i32
  }
  func.func @transform_4(%arg0: i32) -> (i32, i32) {
    %c0_i32 = arith.constant 0 : i32
    %c0_i32_0 = arith.constant 0 : i32
    %c0_i32_1 = arith.constant 0 : i32
    return %c0_i32, %c0_i32_0 : i32, i32
  }
  func.func @transform_5(%arg0: i32) -> (i32, i32) {
    %c0_i32 = arith.constant 0 : i32
    %c0_i32_0 = arith.constant 0 : i32
    %c0_i32_1 = arith.constant 0 : i32
    return %c0_i32, %c0_i32_0 : i32, i32
  }
  func.func @transform_6(%arg0: i32) -> (i32, i32, i32) {
    %c0_i32 = arith.constant 0 : i32
    %c0_i32_0 = arith.constant 0 : i32
    %c0_i32_1 = arith.constant 0 : i32
    return %arg0, %c0_i32, %c0_i32_0 : i32, i32, i32
  }
}

</mosaic_0001>

<bundles_post_ra>
// kernel: rep_n_bottleneck.1
= control target key start
LH: loop header
LB: loop body
LE: loop exit
PB: predicated region body
PF: predicated region fallthrough
CT: control target
= control target key end

     0   :  { %s3027_s21 = smov 0   ;;  %s3417_s0 = inlined_call_operand.vmem [shape: bf16[2,4,342], index: 0, kind: input, shape index: {}]   ;;  %s3418_s1 = inlined_call_operand.vmem [shape: bf16[9,2,4], index: 1, kind: input, shape index: {}]   ;;  %s3419_s2 = inlined_call_operand.vmem [shape: f32[2,1], index: 2, kind: input, shape index: {}]   ;;  %s3420_s3 = inlined_call_operand.vmem [shape: bf16[9,4,2], index: 3, kind: input, shape index: {}]   ;;  %s3421_s4 = inlined_call_operand.vmem [shape: f32[4,1], index: 4, kind: input, shape index: {}]   ;;  %s3422_s5 = inlined_call_operand.vmem [shape: f32[1,288], index: 5, kind: input, shape index: {}]   ;;  %s3423_s6 = inlined_call_operand.vmem [shape: f32[2,4,288], index: 6, kind: output, shape index: {}]  }
   0x1 LB: > { %s2676_s22 = sadd.s32 4294967295, %s2976_s21   ;;  %p2680_p0 = scmp.ge.s32.totalorder %s2976_s21, 1  ;;  %s2976_s21 = sphi %s3027_s21, %s16_s21  }
   0x2   : > { %p212_p1 = scmp.lt.s32.totalorder %s2976_s21, 3 }
   0x4   : > { %p213_p2 = pnand %p2680_p0, %p212_p1 }
   0x5   : > { %p242_p3 = scmp.lt.s32.totalorder (!%p213_p2), %s2676_s22, 1  ;;  %v262_v0 = vlaneseq (!%p213_p2)  ;;  %v2978_v1 = vmov (!%p213_p2), 1983009808   ;;  %v2979_v4 = vmov (!%p213_p2), 0.0   ;;  %vm2980_vm0 = vmmov (!%p213_p2), 0   ;;  %s2982_s27 = smov (!%p213_p2), 127  }
   0x6   : > { %216 = sbr.rel (%p213_p2) target bundleno = 1033 (0x409), region = 44  ;;  %v260_v2 = vunpack.c.l.s4 (!%p213_p2), %v2978_v1  ;;  %2800 = vmatprep.subr.bf16.mxu1 (!%p213_p2), %v2979_v4  ;;  %2802 = vmatprep.mubr.msk.bf16.mxu1 (!%p213_p2), %vm2980_vm0, %v2979_v4  ;;  %v2981_v6 = vmov (!%p213_p2), 0   ;;  %s2983_s28 = smov (!%p213_p2), 126   ;;  %v1328_v43 = vld [vmem:[%s3419_s2] sm:$0x3] (!%p213_p2)  ;;  %vm287_vm1 = vcmask (!%p213_p2), 1041408  }
   0x7   : > { %v3037_v3 = vshrl.u32 (!%p213_p2), %v262_v0, 7  ;;  %329 = vmatprep.mubr.bf16.mxu0 (!%p213_p2), %v2981_v6  ;;  %2932 = vset.pattern.permute.xlu0 (!%p213_p2), %v2981_v6  ;;  %s2984_s29 = smov (!%p213_p2), 110   ;;  %s2985_s30 = smov (!%p213_p2), 109   ;;  %vm280_vm2 = vcmask (!%p213_p2), 1039360   ;;  %v2683_v48 = vld [vmem:[%s3418_s1 + $0x1] sm:$0x1] (!%p213_p2) }
   0x8   : > { %v261_v5 = vunpack.c.0.s8 (!%p213_p2), %v260_v2  ;;  %2933 = vset.pattern.permute.xlu1 (!%p213_p2), %v2981_v6  ;;  %s2986_s7 = smov (!%p213_p2), 108   ;;  %s2987_s8 = smov (!%p213_p2), 92   ;;  %vm283_vm3 = vcmask (!%p213_p2), 31744   ;;  %vm497_vm4 = vcmask (!%p213_p2), 1031168   ;;  %v254_v58 = vld [vmem:[%s3418_s1] sm:$0x1] (!%p213_p2) }
   0x9   : > { %s2988_s9 = smov (!%p213_p2), 91   ;;  %s2989_s10 = smov (!%p213_p2), 90   ;;  %vm622_vm5 = vcmask (!%p213_p2), 900096   ;;  %vm729_vm6 = vcmask (!%p213_p2), 891904   ;;  %vm854_vm7 = vcmask (!%p213_p2), 883712   ;;  %vm979_vm8 = vcmask (!%p213_p2), 752640  }
   0xa   : > { %v3046_v7 = vsub.s32 (!%p213_p2), %v261_v5, %v3037_v3  ;;  %v2690_v5 = vld [vmem:[%s3418_s1 + $0x2] sm:$0x1] (!%p213_p2)  ;;  %vm1104_vm9 = vcmask (!%p213_p2), 744448   ;;  %vm1229_vm10 = vcmask (!%p213_p2), 736256   ;;  %vm1378_vm11 = vcmask (!%p213_p2), 147456   ;;  %s2991_s19 = smov (!%p213_p2), 19  }
   0xb   : > { %vm1380_vm12 = vcmask (!%p213_p2), 696728   ;;  %1379 = vst.msk [vmem:[#allocation2] sm:$0x1] (!%p213_p2), %vm1378_vm11, %v2981_v6  ;;  %vm1417_vm13 = vcmask (!%p213_p2), 1040536   ;;  %vm1418_vm14 = vcmask (!%p213_p2), 1041409  }
   0xc   : > { %1381 = vst.msk [vmem:[#allocation2 + $0x2] sm:$0x1] (!%p213_p2), %vm1380_vm12, %v2981_v6  ;;  %vm1419_vm15 = vmor (!%p213_p2), %vm1418_vm14, %vm1417_vm13  ;;  %vm1463_vm12 = vcmask (!%p213_p2), 1040384   ;;  %vm1459_vm13 = vcmask (!%p213_p2), 15360  }
   0xd   : > { %s3425_s22 = smov (!%p242_p3, %s2676_s22), 1 }
   0xe   : > { %s2908_s23 = smul.u32 6, %s3425_s22 }
   0xf   : > { %s2909_s18 = smul.u32 12, %s3425_s22 }
  0x10   : > { %s3052_s26 = scalar_lea.vmem %s3417_s0, %s2908_s23 }
  0x11   : > { %v3055_v8 = vld [vmem:[%s3052_s26] sm:$0x3f] }
  0x12   : > { %v3059_v9 = vrot.slane %v3055_v8, %v3046_v7  ;;  %v258_v10 = vcombine.high %v3055_v8, %v3055_v8  ;;  %v471_v11 = vld [vmem:[%s3052_s26] sm:$0x3f] }
  0x13   : > { %v482_v14 = vrot.slane %v471_v11, %v3046_v7  ;;  %v475_v15 = vcombine.high %v471_v11, %v471_v11  ;;  %v596_v17 = vld [vmem:[%s3052_s26] sm:$0x3f] }
  0x14   : > { %274 = vrot.lane.b32.xlu0 %v3059_v9, %s2982_s27  ;;  %v3067_v12 = vrot.slane %v258_v10, %v3046_v7  ;;  %v3071_v13 = vcombine.high %v3059_v9, %v3059_v9  ;;  %v607_v19 = vrot.slane %v596_v17, %v3046_v7  ;;  %v600_v20 = vcombine.high %v596_v17, %v596_v17  ;;  %v828_v23 = vld [vmem:[%s3052_s26] sm:$0x3f] }
  0x15   : > { %v490_v16 = vcombine.high %v482_v14, %v482_v14  ;;  %v489_v18 = vrot.slane %v475_v15, %v3046_v7  ;;  %v839_v24 = vrot.slane %v828_v23, %v3046_v7  ;;  %v832_v25 = vcombine.high %v828_v23, %v828_v23  ;;  %v953_v27 = vld [vmem:[%s3052_s26] sm:$0x3f] }
  0x16   : > { %278 = vrot.lane.b32.xlu1 %v3067_v12, %s2982_s27  ;;  %v615_v21 = vcombine.high %v607_v19, %v607_v19  ;;  %v614_v22 = vrot.slane %v600_v20, %v3046_v7  ;;  %v964_v29 = vrot.slane %v953_v27, %v3046_v7  ;;  %v957_v30 = vcombine.high %v953_v27, %v953_v27  ;;  %v1078_v32 = vld [vmem:[%s3052_s26] sm:$0x3f] }
  0x17   : > { %v847_v26 = vcombine.high %v839_v24, %v839_v24  ;;  %v846_v28 = vrot.slane %v832_v25, %v3046_v7  ;;  %v1089_v34 = vrot.slane %v1078_v32, %v3046_v7  ;;  %v1082_v35 = vcombine.high %v1078_v32, %v1078_v32  ;;  %v1203_v37 = vld [vmem:[%s3052_s26] sm:$0x3f] }
  0x18   : > { %276 = vrot.lane.b32.xlu0 %v3071_v13, %s2982_s27  ;;  %v972_v31 = vcombine.high %v964_v29, %v964_v29  ;;  %v971_v33 = vrot.slane %v957_v30, %v3046_v7  ;;  %v1214_v39 = vrot.slane %v1203_v37, %v3046_v7  ;;  %v1207_v40 = vcombine.high %v1203_v37, %v1203_v37  ;;  %v2702_v32 = vld [vmem:[%s3418_s1 + $0x5] sm:$0x1] }
  0x19   : > { %v1097_v36 = vcombine.high %v1089_v34, %v1089_v34  ;;  %v1096_v38 = vrot.slane %v1082_v35, %v3046_v7  ;;  %v388_v51 = vsel %vm287_vm1, %v3067_v12, 0  ;;  %v382_v54 = vsel %vm287_vm1, %v3059_v9, 0 }
  0x1a   : > { %491 = vrot.lane.b32.xlu1 %v482_v14, %s2983_s28  ;;  %v1222_v41 = vcombine.high %v1214_v39, %v1214_v39  ;;  %v1221_v42 = vrot.slane %v1207_v40, %v3046_v7 }
  0x1c   : > { %493 = vrot.lane.b32.xlu0 %v490_v16, %s2983_s28  ;;  %v2694_v16 = vld [vmem:[%s3418_s1 + $0x3] sm:$0x1] }
  0x1e   : > { %495 = vrot.lane.b32.xlu1 %v489_v18, %s2983_s28 }
  0x20   : > { %616 = vrot.lane.b32.xlu0 %v607_v19, %s2984_s29 }
  0x22   : > { %618 = vrot.lane.b32.xlu1 %v615_v21, %s2984_s29 }
  0x24   : > { %620 = vrot.lane.b32.xlu0 %v614_v22, %s2984_s29 }
  0x26   : > { %723 = vrot.lane.b32.xlu1 %v3059_v9, %s2985_s30 }
  0x28   : > { %725 = vrot.lane.b32.xlu0 %v3071_v13, %s2985_s30 }
  0x2a   : > { %727 = vrot.lane.b32.xlu1 %v3067_v12, %s2985_s30 }
  0x2c   : > { %848 = vrot.lane.b32.xlu0 %v839_v24, %s2986_s7  ;;  %v2698_v24 = vld [vmem:[%s3418_s1 + $0x4] sm:$0x1] }
  0x2e   : > { %850 = vrot.lane.b32.xlu1 %v847_v26, %s2986_s7 }
  0x30   : > { %852 = vrot.lane.b32.xlu0 %v846_v28, %s2986_s7 }
  0x32   : > { %973 = vrot.lane.b32.xlu1 %v964_v29, %s2987_s8 }
  0x34   : > { %975 = vrot.lane.b32.xlu0 %v972_v31, %s2987_s8 }
  0x36   : > { %977 = vrot.lane.b32.xlu1 %v971_v33, %s2987_s8 }
  0x38   : > { %1098 = vrot.lane.b32.xlu0 %v1089_v34, %s2988_s9 }
  0x3a   : > { %1100 = vrot.lane.b32.xlu1 %v1097_v36, %s2988_s9 }
  0x3c   : > { %1102 = vrot.lane.b32.xlu0 %v1096_v38, %s2988_s9 }
  0x3e   : > { %1223 = vrot.lane.b32.xlu1 %v1214_v39, %s2989_s10  ;;  %v2706_v39 = vld [vmem:[%s3418_s1 + $0x6] sm:$0x1] }
  0x40   : > { %1225 = vrot.lane.b32.xlu0 %v1222_v41, %s2989_s10 }
  0x42   : > { %1227 = vrot.lane.b32.xlu1 %v1221_v42, %s2989_s10 }
  0x44   : > { %1331 = vperm.xlu0 %2932, %v1328_v43  }
  0x86   : > { %v275_v44 = vpop.permute.xlu0 %274 }
  0x88   : > { %v279_v45 = vpop.permute.xlu1 %278 }
  0x89   : > { %v295_v46 = vsel %vm287_vm1, %v279_v45, 0 }
  0x8a   : > { %v277_v47 = vpop.permute.xlu0 %276  ;;  %2801 = vmatpush3.bf16.msra.mxu1 %v295_v46  ;;  %v2710_v46 = vld [vmem:[%s3418_s1 + $0x7] sm:$0x1] }
  0x8b   : > { %v282_v49 = vsel %vm280_vm2, %v277_v47, %v279_v45  ;;  %v281_v50 = vsel %vm280_vm2, %v275_v44, %v277_v47  ;;  %2806 = vmatprep.subr.bf16.mxu1 %v2979_v4 }
  0x8c   : > { %2684 = vmatprep.subr.msk.bf16.mxu0 %vm287_vm1, %v282_v49  ;;  %v289_v52 = vsel %vm287_vm1, %v281_v50, 0  ;;  %v492_v53 = vpop.permute.xlu1 %491  ;;  %v2714_v50 = vld [vmem:[%s3418_s1 + $0x8] sm:$0x1] }
  0x8d   : > { %298 = vmatpush1.bf16.msra.mxu0 %v289_v52  ;;  %2803 = vmatmul.mubr.msk.bf16.vlgmr.msra.gmra.mrb[0].mxu1 %vm283_vm3, %v2683_v48 }
  0x8e   : > { %2807 = vmatpush3.bf16.msra.mxu1 %v388_v51  ;;  %2687 = vmatprep.subr.msk.bf16.mxu0 %vm287_vm1, %v3071_v13  ;;  %v494_v55 = vpop.permute.xlu0 %493 }
  0x8f   : > { %2808 = vmatprep.mubr.msk.bf16.mxu1 %vm2980_vm0, %v2979_v4  ;;  %2812 = vmatprep.subr.bf16.mxu1 %v2979_v4  ;;  %v498_v60 = vsel %vm497_vm4, %v492_v53, %v494_v55 }
  0x90   : > { %2685 = vmatmul.mubr.msk.bf16.vlgmr.msra.gmra.mrb[0].mxu0 %vm283_vm3, %v2683_v48  ;;  %v496_v56 = vpop.permute.xlu1 %495  ;;  %v504_v63 = vsel %vm287_vm1, %v498_v60, 0 }
  0x91   : > { %391 = vmatpush1.bf16.msra.mxu0 %v382_v54  ;;  %v499_v57 = vsel %vm497_vm4, %v494_v55, %v496_v56  ;;  %422 = vmatprep.mubr.bf16.mxu0 %v2981_v6  ;;  %v510_v61 = vsel %vm287_vm1, %v496_v56, 0 }
  0x92   : > { %2691 = vmatprep.subr.msk.bf16.mxu0 %vm287_vm1, %v499_v57  ;;  %v617_v59 = vpop.permute.xlu0 %616 }
  0x94   : > { %v619_v62 = vpop.permute.xlu1 %618 }
  0x95   : > { %2809 = vmatmul.mubr.msk.bf16.vlgmr.msra.gmra.mrb[4].mxu1 %vm283_vm3, %v254_v58  ;;  %v623_v10 = vsel %vm622_vm5, %v617_v59, %v619_v62 }
  0x96   : > { %2813 = vmatpush3.bf16.msra.mxu1 %v510_v61  ;;  %2814 = vmatprep.mubr.msk.bf16.mxu1 %vm2980_vm0, %v2979_v4  ;;  %v621_v0 = vpop.permute.xlu0 %620  ;;  %v629_v12 = vsel %vm287_vm1, %v623_v10, 0 }
  0x97   : > { %v624_v1 = vsel %vm622_vm5, %v619_v62, %v621_v0  ;;  %2818 = vmatprep.subr.bf16.mxu1 %v2979_v4  ;;  %v635_v9 = vsel %vm287_vm1, %v621_v0, 0 }
  0x98   : > { %2688 = vmatmul.mubr.msk.bf16.vlgmr.msra.gmra.mrb[4].mxu0 %vm283_vm3, %v254_v58  ;;  %v724_v2 = vpop.permute.xlu1 %723 }
  0x99   : > { %513 = vmatpush1.bf16.msra.mxu0 %v504_v63  ;;  %544 = vmatprep.mubr.bf16.mxu0 %v2981_v6 }
  0x9a   : > { %2695 = vmatprep.subr.msk.bf16.mxu0 %vm287_vm1, %v624_v1  ;;  %v726_v7 = vpop.permute.xlu0 %725 }
  0x9b   : > { %v730_v17 = vsel %vm729_vm6, %v724_v2, %v726_v7 }
  0x9c   : > { %v728_v11 = vpop.permute.xlu1 %727  ;;  %v736_v20 = vsel %vm287_vm1, %v730_v17, 0 }
  0x9d   : > { %2815 = vmatmul.mubr.msk.bf16.vlgmr.msra.gmra.mrb[8].mxu1 %vm283_vm3, %v2690_v5  ;;  %v731_v14 = vsel %vm729_vm6, %v726_v7, %v728_v11  ;;  %v742_v18 = vsel %vm287_vm1, %v728_v11, 0 }
  0x9e   : > { %2819 = vmatpush3.bf16.msra.mxu1 %v635_v9  ;;  %2820 = vmatprep.mubr.msk.bf16.mxu1 %vm2980_vm0, %v2979_v4  ;;  %v849_v13 = vpop.permute.xlu0 %848 }
  0x9f   : > { %2824 = vmatprep.subr.bf16.mxu1 %v2979_v4 }
  0xa0   : > { %2692 = vmatmul.mubr.msk.bf16.vlgmr.msra.gmra.mrb[8].mxu0 %vm283_vm3, %v2690_v5  ;;  %v851_v15 = vpop.permute.xlu1 %850 }
  0xa1   : > { %638 = vmatpush1.bf16.msra.mxu0 %v629_v12  ;;  %669 = vmatprep.mubr.bf16.mxu0 %v2981_v6  ;;  %v855_v26 = vsel %vm854_vm7, %v849_v13, %v851_v15 }
  0xa2   : > { %2699 = vmatprep.subr.msk.bf16.mxu0 %vm287_vm1, %v731_v14  ;;  %v853_v19 = vpop.permute.xlu0 %852  ;;  %v861_v28 = vsel %vm287_vm1, %v855_v26, 0 }
  0xa3   : > { %v856_v22 = vsel %vm854_vm7, %v851_v15, %v853_v19  ;;  %v867_v25 = vsel %vm287_vm1, %v853_v19, 0 }
  0xa4   : > { %v974_v21 = vpop.permute.xlu1 %973 }
  0xa5   : > { %2821 = vmatmul.mubr.msk.bf16.vlgmr.msra.gmra.mrb[12].mxu1 %vm283_vm3, %v2694_v16 }
  0xa6   : > { %2825 = vmatpush3.bf16.msra.mxu1 %v742_v18  ;;  %2826 = vmatprep.mubr.msk.bf16.mxu1 %vm2980_vm0, %v2979_v4  ;;  %v976_v23 = vpop.permute.xlu0 %975 }
  0xa7   : > { %2830 = vmatprep.subr.bf16.mxu1 %v2979_v4  ;;  %v980_v33 = vsel %vm979_vm8, %v974_v21, %v976_v23 }
  0xa8   : > { %2696 = vmatmul.mubr.msk.bf16.vlgmr.msra.gmra.mrb[12].mxu0 %vm283_vm3, %v2694_v16  ;;  %v978_v27 = vpop.permute.xlu1 %977  ;;  %v986_v36 = vsel %vm287_vm1, %v980_v33, 0 }
  0xa9   : > { %745 = vmatpush1.bf16.msra.mxu0 %v736_v20  ;;  %776 = vmatprep.mubr.bf16.mxu0 %v2981_v6  ;;  %v981_v30 = vsel %vm979_vm8, %v976_v23, %v978_v27  ;;  %v992_v34 = vsel %vm287_vm1, %v978_v27, 0 }
  0xaa   : > { %2703 = vmatprep.subr.msk.bf16.mxu0 %vm287_vm1, %v856_v22  ;;  %v1099_v29 = vpop.permute.xlu0 %1098 }
  0xac   : > { %v1101_v31 = vpop.permute.xlu1 %1100 }
  0xad   : > { %2827 = vmatmul.mubr.msk.bf16.vlgmr.msra.gmra.mrb[16].mxu1 %vm283_vm3, %v2698_v24  ;;  %v1105_v41 = vsel %vm1104_vm9, %v1099_v29, %v1101_v31 }
  0xae   : > { %2831 = vmatpush3.bf16.msra.mxu1 %v867_v25  ;;  %2832 = vmatprep.mubr.msk.bf16.mxu1 %vm2980_vm0, %v2979_v4  ;;  %v1103_v35 = vpop.permute.xlu0 %1102  ;;  %v1111_v44 = vsel %vm287_vm1, %v1105_v41, 0 }
  0xaf   : > { %2836 = vmatprep.subr.bf16.mxu1 %v2979_v4  ;;  %v1106_v38 = vsel %vm1104_vm9, %v1101_v31, %v1103_v35  ;;  %v1117_v40 = vsel %vm287_vm1, %v1103_v35, 0 }
  0xb0   : > { %2700 = vmatmul.mubr.msk.bf16.vlgmr.msra.gmra.mrb[16].mxu0 %vm283_vm3, %v2698_v24  ;;  %v1224_v37 = vpop.permute.xlu1 %1223 }
  0xb1   : > { %870 = vmatpush1.bf16.msra.mxu0 %v861_v28  ;;  %901 = vmatprep.mubr.bf16.mxu0 %v2981_v6 }
  0xb2   : > { %2707 = vmatprep.subr.msk.bf16.mxu0 %vm287_vm1, %v981_v30  ;;  %v1226_v42 = vpop.permute.xlu0 %1225 }
  0xb3   : > { %v1230_v47 = vsel %vm1229_vm10, %v1224_v37, %v1226_v42 }
  0xb4   : > { %v1228_v43 = vpop.permute.xlu1 %1227  ;;  %v1236_v49 = vsel %vm287_vm1, %v1230_v47, 0 }
  0xb5   : > { %2833 = vmatmul.mubr.msk.bf16.vlgmr.msra.gmra.mrb[20].mxu1 %vm283_vm3, %v2702_v32  ;;  %v1231_v45 = vsel %vm1229_vm10, %v1226_v42, %v1228_v43  ;;  %v1242_v48 = vsel %vm287_vm1, %v1228_v43, 0 }
  0xb6   : > { %2837 = vmatpush3.bf16.msra.mxu1 %v992_v34  ;;  %2838 = vmatprep.mubr.msk.bf16.mxu1 %vm2980_vm0, %v2979_v4 }
  0xb7   : > { %2842 = vmatprep.subr.bf16.mxu1 %v2979_v4 }
  0xb8   : > { %2704 = vmatmul.mubr.msk.bf16.vlgmr.msra.gmra.mrb[20].mxu0 %vm283_vm3, %v2702_v32 }
  0xb9   : > { %995 = vmatpush1.bf16.msra.mxu0 %v986_v36  ;;  %1026 = vmatprep.mubr.bf16.mxu0 %v2981_v6 }
  0xba   : > { %2711 = vmatprep.subr.msk.bf16.mxu0 %vm287_vm1, %v1106_v38 }
  0xbd   : > { %2839 = vmatmul.mubr.msk.bf16.vlgmr.msra.gmra.mrb[24].mxu1 %vm283_vm3, %v2706_v39 }
  0xbe   : > { %2843 = vmatpush3.bf16.msra.mxu1 %v1117_v40  ;;  %2844 = vmatprep.mubr.msk.bf16.mxu1 %vm2980_vm0, %v2979_v4 }
  0xbf   : > { %2848 = vmatprep.subr.bf16.mxu1 %v2979_v4 }
  0xc0   : > { %2708 = vmatmul.mubr.msk.bf16.vlgmr.msra.gmra.mrb[24].mxu0 %vm283_vm3, %v2706_v39 }
  0xc1   : > { %1120 = vmatpush1.bf16.msra.mxu0 %v1111_v44  ;;  %1151 = vmatprep.mubr.bf16.mxu0 %v2981_v6 }
  0xc2   : > { %2715 = vmatprep.subr.msk.bf16.mxu0 %vm287_vm1, %v1231_v45  ;;  %vm1420_vm1 = vcmask 411650  }
  0xc3   : > { %vm1421_vm11 = vmor %vm1420_vm1, %vm1419_vm15 }
  0xc5   : > { %2845 = vmatmul.mubr.msk.bf16.vlgmr.msra.gmra.mrb[28].mxu1 %vm283_vm3, %v2710_v46 }
  0xc6   : > { %2849 = vmatpush3.bf16.msra.mxu1 %v1242_v48  ;;  %2850 = vmatprep.mubr.msk.bf16.mxu1 %vm2980_vm0, %v2979_v4 }
  0xc7   : > { %2854 = vmatprep.subr.bf16.mxu1 %v2979_v4 }
  0xc8   : > { %2712 = vmatmul.mubr.msk.bf16.vlgmr.msra.gmra.mrb[28].mxu0 %vm283_vm3, %v2710_v46 }
  0xc9   : > { %1245 = vmatpush1.bf16.msra.mxu0 %v1236_v49  ;;  %1276 = vmatprep.mubr.bf16.mxu0 %v2981_v6 }
  0xcd   : > { %2851 = vmatmul.mubr.msk.bf16.vlgmr.msra.gmra.mrb[32].mxu1 %vm283_vm3, %v2714_v50 }
  0xce   : > { %2856 = vmatprep.mubr.msk.bf16.mxu1 %vm2980_vm0, %v2979_v4 }
  0xd0   : > { %2716 = vmatmul.mubr.msk.bf16.vlgmr.msra.gmra.mrb[32].mxu0 %vm283_vm3, %v2714_v50  ;;  %vm1414_vm3 = vcmask 154624  }
  0xd1   : > { %1505 = vmatprep.mubr.bf16.mxu0 %v2981_v6 }
 0x160   : > { %v372_v51 = vpop.f32.mrb[0].mxu1 }
 0x161   : > { %v2804_v52 = vpop.f32.mrb[1].mxu1 }
 0x162   : > { %v375_v53 = vpop.f32.mrb[2].mxu1 }
 0x163   : > { %v331_v54 = vpop.f32.mrb[0].mxu0  ;;  %v2805_v55 = vpop.f32.mrb[3].mxu1 }
 0x164   : > { %v333_v56 = vpop.f32.mrb[1].mxu0 }
 0x165   : > { %v335_v57 = vpop.f32.mrb[2].mxu0 }
 0x166   : > { %v336_v58 = vpop.f32.mrb[3].mxu0 }
 0x168   : > { %v465_v59 = vpop.f32.mrb[4].mxu1 }
 0x169   : > { %v466_v60 = vadd.f32 %v465_v59, %v372_v51  ;;  %v2810_v61 = vpop.f32.mrb[5].mxu1 }
 0x16a   : > { %v468_v62 = vpop.f32.mrb[6].mxu1 }
 0x16b   : > { %v424_v63 = vpop.f32.mrb[4].mxu0  ;;  %v2811_v0 = vpop.f32.mrb[7].mxu1 }
 0x16c   : > { %v425_v1 = vadd.f32 %v424_v63, %v331_v54  ;;  %v426_v2 = vpop.f32.mrb[5].mxu0 }
 0x16d   : > { %v427_v5 = vadd.f32 %v426_v2, %v333_v56  ;;  %v428_v7 = vpop.f32.mrb[6].mxu0 }
 0x16e   : > { %v429_v9 = vpop.f32.mrb[7].mxu0 }
 0x170   : > { %v587_v10 = vpop.f32.mrb[8].mxu1 }
 0x171   : > { %v595_v11 = vadd.f32 %v587_v10, %v466_v60  ;;  %v2816_v12 = vpop.f32.mrb[9].mxu1 }
 0x172   : > { %v590_v13 = vpop.f32.mrb[10].mxu1 }
 0x173   : > { %v546_v14 = vpop.f32.mrb[8].mxu0  ;;  %v2817_v15 = vpop.f32.mrb[11].mxu1 }
 0x174   : > { %v593_v16 = vadd.f32 %v546_v14, %v425_v1  ;;  %v548_v17 = vpop.f32.mrb[9].mxu0 }
 0x175   : > { %v594_v18 = vadd.f32 %v548_v17, %v427_v5  ;;  %v550_v19 = vpop.f32.mrb[10].mxu0  ;;  %v1332_v17 = vpop.permute.xlu0 %1331 }
 0x176   : > { %v551_v20 = vpop.f32.mrb[11].mxu0 }
 0x178   : > { %v712_v21 = vpop.f32.mrb[12].mxu1 }
 0x179   : > { %v720_v22 = vadd.f32 %v712_v21, %v595_v11  ;;  %v2822_v23 = vpop.f32.mrb[13].mxu1 }
 0x17a   : > { %v715_v24 = vpop.f32.mrb[14].mxu1 }
 0x17b   : > { %v671_v25 = vpop.f32.mrb[12].mxu0  ;;  %v2823_v26 = vpop.f32.mrb[15].mxu1 }
 0x17c   : > { %v718_v27 = vadd.f32 %v671_v25, %v593_v16  ;;  %v673_v28 = vpop.f32.mrb[13].mxu0 }
 0x17d   : > { %v719_v29 = vadd.f32 %v673_v28, %v594_v18  ;;  %v675_v30 = vpop.f32.mrb[14].mxu0 }
 0x17e   : > { %v676_v31 = vpop.f32.mrb[15].mxu0 }
 0x180   : > { %v819_v32 = vpop.f32.mrb[16].mxu1 }
 0x181   : > { %v827_v33 = vadd.f32 %v819_v32, %v720_v22  ;;  %v2828_v34 = vpop.f32.mrb[17].mxu1 }
 0x182   : > { %v822_v35 = vpop.f32.mrb[18].mxu1 }
 0x183   : > { %v778_v36 = vpop.f32.mrb[16].mxu0  ;;  %v2829_v37 = vpop.f32.mrb[19].mxu1 }
 0x184   : > { %v825_v38 = vadd.f32 %v778_v36, %v718_v27  ;;  %v780_v39 = vpop.f32.mrb[17].mxu0 }
 0x185   : > { %v826_v40 = vadd.f32 %v780_v39, %v719_v29  ;;  %v782_v41 = vpop.f32.mrb[18].mxu0 }
 0x186   : > { %v783_v42 = vpop.f32.mrb[19].mxu0 }
 0x188   : > { %v944_v43 = vpop.f32.mrb[20].mxu1 }
 0x189   : > { %v952_v44 = vadd.f32 %v944_v43, %v827_v33  ;;  %v2834_v45 = vpop.f32.mrb[21].mxu1  ;;  %v1370_v43 = vsub.s32 2, %v3037_v3 }
 0x18a   : > { %v947_v46 = vpop.f32.mrb[22].mxu1  ;;  %v1362_v45 = vsub.s32 0, %v3037_v3 }
 0x18b   : > { %v903_v47 = vpop.f32.mrb[20].mxu0  ;;  %v2835_v48 = vpop.f32.mrb[23].mxu1  ;;  %v2990_v46 = vmov 1966171168  }
 0x18c   : > { %v950_v49 = vadd.f32 %v903_v47, %v825_v38  ;;  %v905_v50 = vpop.f32.mrb[21].mxu0  ;;  %v1390_v47 = vunpack.c.l.s4 %v2990_v46 }
 0x18d   : > { %v951_v51 = vadd.f32 %v905_v50, %v826_v40  ;;  %v907_v52 = vpop.f32.mrb[22].mxu0 }
 0x18e   : > { %v908_v53 = vpop.f32.mrb[23].mxu0 }
 0x190   : > { %v1069_v54 = vpop.f32.mrb[24].mxu1 }
 0x191   : > { %v1077_v55 = vadd.f32 %v1069_v54, %v952_v44  ;;  %v2840_v56 = vpop.f32.mrb[25].mxu1  ;;  %v1358_v44 = vld [vmem:[%s3422_s5] sm:$0x7]  ;;  %v1391_v54 = vunpack.c.0.s8 %v1390_v47 }
 0x192   : > { %v1072_v57 = vpop.f32.mrb[26].mxu1  ;;  %v1371_v48 = vrot.slane %v1358_v44, %v1370_v43  ;;  %v1363_v52 = vrot.slane %v1358_v44, %v1362_v45  ;;  %v2727_v45 = vld [vmem:[%s3420_s3 + $0x4] sm:$0x3] }
 0x193   : > { %v1028_v58 = vpop.f32.mrb[24].mxu0  ;;  %v2841_v59 = vpop.f32.mrb[27].mxu1 }
 0x194   : > { %v1075_v60 = vadd.f32 %v1028_v58, %v950_v49  ;;  %v1030_v61 = vpop.f32.mrb[25].mxu0  ;;  %v1366_v49 = vsub.s32 1, %v3037_v3 }
 0x195   : > { %v1076_v62 = vadd.f32 %v1030_v61, %v951_v51  ;;  %v1032_v63 = vpop.f32.mrb[26].mxu0  ;;  %v1394_v61 = vsub.s32 %v1391_v54, %v3037_v3 }
 0x196   : > { %v1033_v0 = vpop.f32.mrb[27].mxu0  ;;  %v1367_v56 = vrot.slane %v1358_v44, %v1366_v49 }
 0x198   : > { %v1194_v1 = vpop.f32.mrb[28].mxu1 }
 0x199   : > { %v1202_v2 = vadd.f32 %v1194_v1, %v1077_v55  ;;  %v2846_v5 = vpop.f32.mrb[29].mxu1 }
 0x19a   : > { %v1197_v7 = vpop.f32.mrb[30].mxu1 }
 0x19b   : > { %v1153_v9 = vpop.f32.mrb[28].mxu0  ;;  %v2847_v10 = vpop.f32.mrb[31].mxu1 }
 0x19c   : > { %v1200_v11 = vadd.f32 %v1153_v9, %v1075_v60  ;;  %v1155_v12 = vpop.f32.mrb[29].mxu0 }
 0x19d   : > { %v1201_v13 = vadd.f32 %v1155_v12, %v1076_v62  ;;  %v1157_v14 = vpop.f32.mrb[30].mxu0 }
 0x19e   : > { %v1158_v15 = vpop.f32.mrb[31].mxu0 }
 0x1a0   : > { %v1319_v16 = vpop.f32.mrb[32].mxu1 }
 0x1a1   : > { %v1327_v18 = vadd.f32 %v1319_v16, %v1202_v2  ;;  %v2852_v19 = vpop.f32.mrb[33].mxu1  ;;  %v2564_v16 = vld [vmem:[%s3421_s4] sm:$0xf] }
 0x1a2   : > { %v1322_v20 = vpop.f32.mrb[34].mxu1 }
 0x1a3   : > { %v1336_v21 = vadd.f32 %v1332_v17, %v1327_v18  ;;  %v1278_v22 = vpop.f32.mrb[32].mxu0  ;;  %v2853_v23 = vpop.f32.mrb[35].mxu1  ;;  %v2595_v18 = vunpack.c.h.bf16 %v3055_v8 }
 0x1a4   : > { %v1325_v24 = vadd.f32 %v1278_v22, %v1200_v11  ;;  %v1280_v25 = vpop.f32.mrb[33].mxu0 }
 0x1a5   : > { %v1339_v26 = vsub.f32 0.0, %v1336_v21  ;;  %v1326_v27 = vadd.f32 %v1280_v25, %v1201_v13  ;;  %v1282_v28 = vpop.f32.mrb[34].mxu0 }
 0x1a6   : > { %v1334_v29 = vadd.f32 %v1332_v17, %v1325_v24  ;;  %v1283_v30 = vpop.f32.mrb[35].mxu0  ;;  %v2719_v28 = vld [vmem:[%s3420_s3 + $0x2] sm:$0x3] }
 0x1a7   : > { %v1344_v31 = vmul.f32 1.442695, %v1339_v26  ;;  %v1335_v32 = vadd.f32 %v1332_v17, %v1326_v27  ;;  %v2594_v17 = vunpack.c.l.bf16 %v3055_v8 }
 0x1a8   : > { %v1337_v33 = vsub.f32 0.0, %v1334_v29 }
 0x1a9   : > { %2946 = vpow2.f32 %v1344_v31  ;;  %v1338_v34 = vsub.f32 0.0, %v1335_v32  ;;  %v2598_v19 = vcombine.high %v2594_v17, %v2594_v17 }
 0x1aa   : > { %v1340_v35 = vmul.f32 1.442695, %v1337_v33 }
 0x1ab   : > { %v1342_v36 = vmul.f32 1.442695, %v1338_v34  ;;  %v2934_v20 = vpack.i.bf16 %v2598_v19, %v2594_v17 }
 0x1ac   : > { %2948 = vpow2.f32 %v1340_v35 }
 0x1ad   : > { %2950 = vpow2.f32 %v1342_v36  ;;  %v1424_v36 = vld [vmem:[%s3420_s3] sm:$0x3] }
 0x1b3   : > { %v2947_v37 = vpop.eup %2946 }
 0x1b4   : > { %v1348_v38 = vadd.f32 1.0, %v2947_v37 }
 0x1b6   : > { %v2949_v39 = vpop.eup %2948  ;;  %2952 = vrcp.f32 %v1348_v38 }
 0x1b7   : > { %v2951_v40 = vpop.eup %2950  ;;  %v1346_v41 = vadd.f32 1.0, %v2949_v39 }
 0x1b8   : > { %v1347_v42 = vadd.f32 1.0, %v2951_v40 }
 0x1b9   : > { %2954 = vrcp.f32 %v1346_v41 }
 0x1ba   : > { %2956 = vrcp.f32 %v1347_v42 }
 0x1c0   : > { %v2953_v50 = vpop.eup %2952 }
 0x1c1   : > { %v1357_v51 = vmul.f32 %v2953_v50, %v1336_v21 }
 0x1c3   : > { %v2955_v53 = vpop.eup %2954  ;;  %v1377_v55 = vmul.f32 %v1371_v48, %v1357_v51 }
 0x1c4   : > { %v2957_v57 = vpop.eup %2956  ;;  %v1355_v58 = vmul.f32 %v2955_v53, %v1334_v29  ;;  %v2732_v53 = vld [vmem:[%s3420_s3 + $0x6] sm:$0x3] }
 0x1c5   : > { %v1356_v59 = vmul.f32 %v2957_v57, %v1335_v32  ;;  %v1384_v62 = vpack.c.bf16 %v1377_v55, %v1377_v55 }
 0x1c6   : > { %v1375_v60 = vmul.f32 %v1363_v52, %v1355_v58 }
 0x1c7   : > { %v1376_v63 = vmul.f32 %v1367_v56, %v1356_v59  ;;  %v1402_v2 = vrot.slane %v1384_v62, %v1394_v61 }
 0x1c9   : > { %v2718_v0 = vpack.c.bf16 %v1376_v63, %v1375_v60 }
 0x1cb   : > { %v1395_v1 = vrot.slane %v2718_v0, %v1394_v61 }
 0x1cd   : > { %v1403_v5 = vcombine.low %v1395_v1, %v1402_v2 }
 0x1cf   : > { %v1410_v7 = vrot.slane %v1403_v5, %v1394_v61 }
 0x1d1   : > { %1411 = vrot.lane.b32.xlu1 %v1410_v7, %s2991_s19  ;;  %v2742_v7 = vld [vmem:[%s3420_s3 + $0xa] sm:$0x3] }
 0x243   : > { %v1412_v9 = vpop.permute.xlu1 %1411 }
 0x244   : > { %v1413_v10 = vrot.slane %v1412_v9, 7 }
 0x246   : > { %v1415_v11 = vsel %vm1414_vm3, %v1413_v10, %v1412_v9 }
 0x247   : > { %1422 = vst.msk [vmem:[#allocation2] sm:$0x7] %vm1421_vm11, %v1415_v11 }
 0x24e   : > { %v2720_v3 = vld.sshfl [vmem:[#allocation2] sm:$0x13 pattern:$0x75316420] }
 0x24f   : > { %v1442_v12 = vrot.slane %v2720_v3, %v1394_v61  ;;  %v1435_v13 = vcombine.high %v2720_v3, %v2720_v3 }
 0x251   : > { %1451 = vrot.lane.b32.xlu1 %v1442_v12, %s2982_s27  ;;  %v1449_v14 = vrot.slane %v1435_v13, %v1394_v61  ;;  %v1450_v15 = vcombine.high %v1442_v12, %v1442_v12  ;;  %v1558_v32 = vsel %vm1463_vm12, %v1442_v12, 0  ;;  %v2737_v61 = vld [vmem:[%s3420_s3 + $0x8] sm:$0x3] }
 0x253   : > { %1453 = vrot.lane.b32.xlu0 %v1449_v14, %s2982_s27  ;;  %v1564_v30 = vsel %vm1463_vm12, %v1450_v15, 0 }
 0x255   : > { %1455 = vrot.lane.b32.xlu1 %v1450_v15, %s2982_s27 }
 0x257   : > { %1674 = vrot.lane.b32.xlu0 %v1442_v12, %s2983_s28 }
 0x259   : > { %1676 = vrot.lane.b32.xlu1 %v1449_v14, %s2983_s28 }
 0x25b   : > { %1678 = vrot.lane.b32.xlu0 %v1450_v15, %s2983_s28  ;;  %s251_s28 = scalar_lea.vmem %s3423_s6, %s2909_s18 }
 0x25d   : > { %1805 = vrot.lane.b32.xlu1 %v1442_v12, %s2984_s29 }
 0x25f   : > { %1807 = vrot.lane.b32.xlu0 %v1449_v14, %s2984_s29 }
 0x261   : > { %1809 = vrot.lane.b32.xlu1 %v1450_v15, %s2984_s29 }
 0x263   : > { %1936 = vrot.lane.b32.xlu0 %v1442_v12, %s2985_s30 }
 0x265   : > { %1938 = vrot.lane.b32.xlu1 %v1449_v14, %s2985_s30 }
 0x267   : > { %1940 = vrot.lane.b32.xlu0 %v1450_v15, %s2985_s30 }
 0x269   : > { %2067 = vrot.lane.b32.xlu1 %v1442_v12, %s2986_s7 }
 0x26b   : > { %2069 = vrot.lane.b32.xlu0 %v1449_v14, %s2986_s7 }
 0x26d   : > { %2071 = vrot.lane.b32.xlu1 %v1450_v15, %s2986_s7 }
 0x26f   : > { %2198 = vrot.lane.b32.xlu0 %v1442_v12, %s2987_s8 }
 0x271   : > { %2200 = vrot.lane.b32.xlu1 %v1449_v14, %s2987_s8 }
 0x273   : > { %2202 = vrot.lane.b32.xlu0 %v1450_v15, %s2987_s8 }
 0x275   : > { %2329 = vrot.lane.b32.xlu1 %v1442_v12, %s2988_s9 }
 0x277   : > { %2331 = vrot.lane.b32.xlu0 %v1449_v14, %s2988_s9 }
 0x279   : > { %2333 = vrot.lane.b32.xlu1 %v1450_v15, %s2988_s9 }
 0x27b   : > { %2460 = vrot.lane.b32.xlu0 %v1442_v12, %s2989_s10 }
 0x27d   : > { %2462 = vrot.lane.b32.xlu1 %v1449_v14, %s2989_s10 }
 0x27f   : > { %2464 = vrot.lane.b32.xlu0 %v1450_v15, %s2989_s10 }
 0x281   : > { %2567 = vperm.xlu1 %2933, %v2564_v16  }
 0x283   : > { %2935 = vrot.lane.b32.xlu0 %v2934_v20, %s2985_s30 }
 0x285   : > { %2603 = vrot.lane.b32.xlu1 %v2595_v18, %s2985_s30 }
 0x2c3   : > { %v1452_v21 = vpop.permute.xlu1 %1451 }
 0x2c5   : > { %v1454_v22 = vpop.permute.xlu0 %1453 }
 0x2c6   : > { %v1457_v23 = vsel %vm280_vm2, %v1452_v21, %v1454_v22  ;;  %v2752_v21 = vld [vmem:[%s3420_s3 + $0xe] sm:$0x3] }
 0x2c7   : > { %v1456_v24 = vpop.permute.xlu1 %1455  ;;  %v1465_v27 = vsel %vm1463_vm12, %v1457_v23, 0 }
 0x2c8   : > { %v1458_v25 = vsel %vm280_vm2, %v1454_v22, %v1456_v24  ;;  %v1471_v26 = vsel %vm1463_vm12, %v1456_v24, 0 }
 0x2c9   : > { %2721 = vmatprep.subr.msk.bf16.mxu0 %vm1463_vm12, %v1458_v25  ;;  %2855 = vmatpush3.bf16.msra.mxu1 %v1471_v26  ;;  %v1675_v8 = vpop.permute.xlu0 %1674  ;;  %v2757_v25 = vld [vmem:[%s3420_s3 + $0x10] sm:$0x3] }
 0x2ca   : > { %1474 = vmatpush1.bf16.msra.mxu0 %v1465_v27  ;;  %2860 = vmatprep.subr.bf16.mxu1 %v2979_v4 }
 0x2cb   : > { %v1677_v29 = vpop.permute.xlu1 %1676  ;;  %2724 = vmatprep.subr.msk.bf16.mxu0 %vm1463_vm12, %v1449_v14  ;;  %v2747_v14 = vld [vmem:[%s3420_s3 + $0xc] sm:$0x3] }
 0x2cc   : > { %2857 = vmatmul.mubr.msk.bf16.vlgmr.msra.gmra.mrb[36].mxu1 %vm1459_vm13, %v2719_v28  ;;  %v1680_v37 = vsel %vm497_vm4, %v1675_v8, %v1677_v29 }
 0x2cd   : > { %2722 = vmatmul.mubr.msk.bf16.vlgmr.msra.gmra.mrb[36].mxu0 %vm1459_vm13, %v2719_v28  ;;  %2861 = vmatpush3.bf16.msra.mxu1 %v1564_v30  ;;  %v1679_v31 = vpop.permute.xlu0 %1678  ;;  %v1686_v41 = vsel %vm1463_vm12, %v1680_v37, 0 }
 0x2ce   : > { %v1681_v33 = vsel %vm497_vm4, %v1677_v29, %v1679_v31  ;;  %1567 = vmatpush1.bf16.msra.mxu0 %v1558_v32  ;;  %2862 = vmatprep.mubr.msk.bf16.mxu1 %vm2980_vm0, %v2979_v4  ;;  %v1692_v39 = vsel %vm1463_vm12, %v1679_v31, 0 }
 0x2cf   : > { %v1806_v34 = vpop.permute.xlu1 %1805  ;;  %2729 = vmatprep.subr.msk.bf16.mxu0 %vm1463_vm12, %v1681_v33  ;;  %2866 = vmatprep.subr.bf16.mxu1 %v2979_v4 }
 0x2d0   : > { %1598 = vmatprep.mubr.bf16.mxu0 %v2981_v6 }
 0x2d1   : > { %v1808_v35 = vpop.permute.xlu0 %1807 }
 0x2d2   : > { %v1811_v46 = vsel %vm622_vm5, %v1806_v34, %v1808_v35 }
 0x2d3   : > { %v1810_v38 = vpop.permute.xlu1 %1809  ;;  %v1817_v49 = vsel %vm1463_vm12, %v1811_v46, 0 }
 0x2d4   : > { %v1812_v40 = vsel %vm622_vm5, %v1808_v35, %v1810_v38  ;;  %2863 = vmatmul.mubr.msk.bf16.vlgmr.msra.gmra.mrb[40].mxu1 %vm1459_vm13, %v1424_v36  ;;  %v1823_v48 = vsel %vm1463_vm12, %v1810_v38, 0 }
 0x2d5   : > { %2867 = vmatpush3.bf16.msra.mxu1 %v1692_v39  ;;  %2725 = vmatmul.mubr.msk.bf16.vlgmr.msra.gmra.mrb[40].mxu0 %vm1459_vm13, %v1424_v36  ;;  %v1937_v42 = vpop.permute.xlu0 %1936 }
 0x2d6   : > { %1695 = vmatpush1.bf16.msra.mxu0 %v1686_v41  ;;  %2868 = vmatprep.mubr.msk.bf16.mxu1 %vm2980_vm0, %v2979_v4 }
 0x2d7   : > { %2734 = vmatprep.subr.msk.bf16.mxu0 %vm1463_vm12, %v1812_v40  ;;  %v1939_v43 = vpop.permute.xlu1 %1938  ;;  %2872 = vmatprep.subr.bf16.mxu1 %v2979_v4 }
 0x2d8   : > { %1726 = vmatprep.mubr.bf16.mxu0 %v2981_v6  ;;  %v1942_v54 = vsel %vm729_vm6, %v1937_v42, %v1939_v43 }
 0x2d9   : > { %v1941_v44 = vpop.permute.xlu0 %1940  ;;  %v1948_v57 = vsel %vm1463_vm12, %v1942_v54, 0 }
 0x2da   : > { %v1943_v51 = vsel %vm729_vm6, %v1939_v43, %v1941_v44  ;;  %v1954_v56 = vsel %vm1463_vm12, %v1941_v44, 0 }
 0x2db   : > { %v2068_v47 = vpop.permute.xlu1 %2067 }
 0x2dc   : > { %2869 = vmatmul.mubr.msk.bf16.vlgmr.msra.gmra.mrb[44].mxu1 %vm1459_vm13, %v2727_v45 }
 0x2dd   : > { %2873 = vmatpush3.bf16.msra.mxu1 %v1823_v48  ;;  %2730 = vmatmul.mubr.msk.bf16.vlgmr.msra.gmra.mrb[44].mxu0 %vm1459_vm13, %v2727_v45  ;;  %v2070_v50 = vpop.permute.xlu0 %2069 }
 0x2de   : > { %1826 = vmatpush1.bf16.msra.mxu0 %v1817_v49  ;;  %2874 = vmatprep.mubr.msk.bf16.mxu1 %vm2980_vm0, %v2979_v4  ;;  %v2073_v62 = vsel %vm854_vm7, %v2068_v47, %v2070_v50 }
 0x2df   : > { %2739 = vmatprep.subr.msk.bf16.mxu0 %vm1463_vm12, %v1943_v51  ;;  %2878 = vmatprep.subr.bf16.mxu1 %v2979_v4  ;;  %v2072_v52 = vpop.permute.xlu1 %2071  ;;  %v2079_v0 = vsel %vm1463_vm12, %v2073_v62, 0 }
 0x2e0   : > { %1857 = vmatprep.mubr.bf16.mxu0 %v2981_v6  ;;  %v2074_v58 = vsel %vm854_vm7, %v2070_v50, %v2072_v52  ;;  %v2085_v63 = vsel %vm1463_vm12, %v2072_v52, 0 }
 0x2e1   : > { %v2199_v55 = vpop.permute.xlu0 %2198 }
 0x2e3   : > { %v2201_v59 = vpop.permute.xlu1 %2200 }
 0x2e4   : > { %2875 = vmatmul.mubr.msk.bf16.vlgmr.msra.gmra.mrb[48].mxu1 %vm1459_vm13, %v2732_v53  ;;  %v2204_v9 = vsel %vm979_vm8, %v2199_v55, %v2201_v59 }
 0x2e5   : > { %2879 = vmatpush3.bf16.msra.mxu1 %v1954_v56  ;;  %2735 = vmatmul.mubr.msk.bf16.vlgmr.msra.gmra.mrb[48].mxu0 %vm1459_vm13, %v2732_v53  ;;  %v2203_v60 = vpop.permute.xlu0 %2202  ;;  %v2210_v3 = vsel %vm1463_vm12, %v2204_v9, 0 }
 0x2e6   : > { %1957 = vmatpush1.bf16.msra.mxu0 %v1948_v57  ;;  %2880 = vmatprep.mubr.msk.bf16.mxu1 %vm2980_vm0, %v2979_v4  ;;  %v2205_v2 = vsel %vm979_vm8, %v2201_v59, %v2203_v60  ;;  %v2216_v11 = vsel %vm1463_vm12, %v2203_v60, 0 }
 0x2e7   : > { %2744 = vmatprep.subr.msk.bf16.mxu0 %vm1463_vm12, %v2074_v58  ;;  %2884 = vmatprep.subr.bf16.mxu1 %v2979_v4  ;;  %v2330_v1 = vpop.permute.xlu1 %2329 }
 0x2e8   : > { %1988 = vmatprep.mubr.bf16.mxu0 %v2981_v6 }
 0x2e9   : > { %v2332_v5 = vpop.permute.xlu0 %2331 }
 0x2ea   : > { %v2335_v15 = vsel %vm1104_vm9, %v2330_v1, %v2332_v5 }
 0x2eb   : > { %v2334_v10 = vpop.permute.xlu1 %2333  ;;  %v2341_v18 = vsel %vm1463_vm12, %v2335_v15, 0 }
 0x2ec   : > { %2881 = vmatmul.mubr.msk.bf16.vlgmr.msra.gmra.mrb[52].mxu1 %vm1459_vm13, %v2737_v61  ;;  %v2336_v13 = vsel %vm1104_vm9, %v2332_v5, %v2334_v10  ;;  %v2347_v17 = vsel %vm1463_vm12, %v2334_v10, 0 }
 0x2ed   : > { %2885 = vmatpush3.bf16.msra.mxu1 %v2085_v63  ;;  %2740 = vmatmul.mubr.msk.bf16.vlgmr.msra.gmra.mrb[52].mxu0 %vm1459_vm13, %v2737_v61  ;;  %v2461_v12 = vpop.permute.xlu0 %2460 }
 0x2ee   : > { %2088 = vmatpush1.bf16.msra.mxu0 %v2079_v0  ;;  %2886 = vmatprep.mubr.msk.bf16.mxu1 %vm2980_vm0, %v2979_v4 }
 0x2ef   : > { %2749 = vmatprep.subr.msk.bf16.mxu0 %vm1463_vm12, %v2205_v2  ;;  %2890 = vmatprep.subr.bf16.mxu1 %v2979_v4  ;;  %v2463_v19 = vpop.permute.xlu1 %2462 }
 0x2f0   : > { %2119 = vmatprep.mubr.bf16.mxu0 %v2981_v6  ;;  %v2466_v22 = vsel %vm1229_vm10, %v2461_v12, %v2463_v19 }
 0x2f1   : > { %v2465_v16 = vpop.permute.xlu0 %2464  ;;  %v2472_v24 = vsel %vm1463_vm12, %v2466_v22, 0 }
 0x2f2   : > { %v2467_v20 = vsel %vm1229_vm10, %v2463_v19, %v2465_v16  ;;  %v2478_v23 = vsel %vm1463_vm12, %v2465_v16, 0 }
 0x2f4   : > { %2887 = vmatmul.mubr.msk.bf16.vlgmr.msra.gmra.mrb[56].mxu1 %vm1459_vm13, %v2742_v7 }
 0x2f5   : > { %2891 = vmatpush3.bf16.msra.mxu1 %v2216_v11  ;;  %2745 = vmatmul.mubr.msk.bf16.vlgmr.msra.gmra.mrb[56].mxu0 %vm1459_vm13, %v2742_v7 }
 0x2f6   : > { %2219 = vmatpush1.bf16.msra.mxu0 %v2210_v3  ;;  %2892 = vmatprep.mubr.msk.bf16.mxu1 %vm2980_vm0, %v2979_v4 }
 0x2f7   : > { %2754 = vmatprep.subr.msk.bf16.mxu0 %vm1463_vm12, %v2336_v13  ;;  %2896 = vmatprep.subr.bf16.mxu1 %v2979_v4 }
 0x2f8   : > { %2250 = vmatprep.mubr.bf16.mxu0 %v2981_v6 }
 0x2fc   : > { %2893 = vmatmul.mubr.msk.bf16.vlgmr.msra.gmra.mrb[60].mxu1 %vm1459_vm13, %v2747_v14 }
 0x2fd   : > { %2897 = vmatpush3.bf16.msra.mxu1 %v2347_v17  ;;  %2750 = vmatmul.mubr.msk.bf16.vlgmr.msra.gmra.mrb[60].mxu0 %vm1459_vm13, %v2747_v14 }
 0x2fe   : > { %2350 = vmatpush1.bf16.msra.mxu0 %v2341_v18  ;;  %2898 = vmatprep.mubr.msk.bf16.mxu1 %vm2980_vm0, %v2979_v4 }
 0x2ff   : > { %2759 = vmatprep.subr.msk.bf16.mxu0 %vm1463_vm12, %v2467_v20  ;;  %2902 = vmatprep.subr.bf16.mxu1 %v2979_v4 }
 0x300   : > { %2381 = vmatprep.mubr.bf16.mxu0 %v2981_v6 }
 0x304   : > { %2899 = vmatmul.mubr.msk.bf16.vlgmr.msra.gmra.mrb[64].mxu1 %vm1459_vm13, %v2752_v21 }
 0x305   : > { %2903 = vmatpush3.bf16.msra.mxu1 %v2478_v23  ;;  %2755 = vmatmul.mubr.msk.bf16.vlgmr.msra.gmra.mrb[64].mxu0 %vm1459_vm13, %v2752_v21 }
 0x306   : > { %2481 = vmatpush1.bf16.msra.mxu0 %v2472_v24  ;;  %2904 = vmatprep.mubr.msk.bf16.mxu1 %vm2980_vm0, %v2979_v4  ;;  %vm2619_vm0 = vcmask 257024  }
 0x307   : > { %2512 = vmatprep.mubr.bf16.mxu0 %v2981_v6 }
 0x30c   : > { %2905 = vmatmul.mubr.msk.bf16.vlgmr.msra.gmra.mrb[68].mxu1 %vm1459_vm13, %v2757_v25 }
 0x30d   : > { %2760 = vmatmul.mubr.msk.bf16.vlgmr.msra.gmra.mrb[68].mxu0 %vm1459_vm13, %v2757_v25 }
 0x39f   : > { %v1548_v26 = vpop.f32.mrb[36].mxu1 }
 0x3a0   : > { %v1507_v27 = vpop.f32.mrb[36].mxu0  ;;  %v2858_v8 = vpop.f32.mrb[37].mxu1 }
 0x3a1   : > { %v1509_v28 = vpop.f32.mrb[37].mxu0  ;;  %v1551_v29 = vpop.f32.mrb[38].mxu1 }
 0x3a2   : > { %v1511_v30 = vpop.f32.mrb[38].mxu0  ;;  %v2859_v31 = vpop.f32.mrb[39].mxu1 }
 0x3a3   : > { %v1512_v32 = vpop.f32.mrb[39].mxu0 }
 0x3a7   : > { %v1641_v33 = vpop.f32.mrb[40].mxu1 }
 0x3a8   : > { %v1600_v4 = vpop.f32.mrb[40].mxu0  ;;  %v1642_v34 = vadd.f32 %v1641_v33, %v1548_v26  ;;  %v2864_v6 = vpop.f32.mrb[41].mxu1 }
 0x3a9   : > { %v1601_v35 = vadd.f32 %v1600_v4, %v1507_v27  ;;  %v1602_v36 = vpop.f32.mrb[41].mxu0  ;;  %v1644_v37 = vpop.f32.mrb[42].mxu1 }
 0x3aa   : > { %v1603_v38 = vadd.f32 %v1602_v36, %v1509_v28  ;;  %v1604_v39 = vpop.f32.mrb[42].mxu0  ;;  %v2865_v40 = vpop.f32.mrb[43].mxu1 }
 0x3ab   : > { %v1605_v41 = vpop.f32.mrb[43].mxu0 }
 0x3af   : > { %v1769_v42 = vpop.f32.mrb[44].mxu1 }
 0x3b0   : > { %v1777_v43 = vadd.f32 %v1769_v42, %v1642_v34  ;;  %v1728_v44 = vpop.f32.mrb[44].mxu0  ;;  %v2870_v45 = vpop.f32.mrb[45].mxu1 }
 0x3b1   : > { %v1775_v46 = vadd.f32 %v1728_v44, %v1601_v35  ;;  %v1730_v47 = vpop.f32.mrb[45].mxu0  ;;  %v1772_v48 = vpop.f32.mrb[46].mxu1 }
 0x3b2   : > { %v1776_v49 = vadd.f32 %v1730_v47, %v1603_v38  ;;  %v1732_v50 = vpop.f32.mrb[46].mxu0  ;;  %v2871_v51 = vpop.f32.mrb[47].mxu1 }
 0x3b3   : > { %v1733_v52 = vpop.f32.mrb[47].mxu0  ;;  %v2568_v45 = vpop.permute.xlu1 %2567 }
 0x3b7   : > { %v1900_v53 = vpop.f32.mrb[48].mxu1 }
 0x3b8   : > { %v1908_v54 = vadd.f32 %v1900_v53, %v1777_v43  ;;  %v1859_v55 = vpop.f32.mrb[48].mxu0  ;;  %v2876_v56 = vpop.f32.mrb[49].mxu1 }
 0x3b9   : > { %v1906_v57 = vadd.f32 %v1859_v55, %v1775_v46  ;;  %v1861_v58 = vpop.f32.mrb[49].mxu0  ;;  %v1903_v59 = vpop.f32.mrb[50].mxu1 }
 0x3ba   : > { %v1907_v60 = vadd.f32 %v1861_v58, %v1776_v49  ;;  %v1863_v61 = vpop.f32.mrb[50].mxu0  ;;  %v2877_v62 = vpop.f32.mrb[51].mxu1 }
 0x3bb   : > { %v1864_v63 = vpop.f32.mrb[51].mxu0 }
 0x3bf   : > { %v2031_v0 = vpop.f32.mrb[52].mxu1 }
 0x3c0   : > { %v2039_v1 = vadd.f32 %v2031_v0, %v1908_v54  ;;  %v1990_v2 = vpop.f32.mrb[52].mxu0  ;;  %v2882_v5 = vpop.f32.mrb[53].mxu1 }
 0x3c1   : > { %v2037_v7 = vadd.f32 %v1990_v2, %v1906_v57  ;;  %v1992_v9 = vpop.f32.mrb[53].mxu0  ;;  %v2034_v10 = vpop.f32.mrb[54].mxu1 }
 0x3c2   : > { %v2038_v11 = vadd.f32 %v1992_v9, %v1907_v60  ;;  %v1994_v3 = vpop.f32.mrb[54].mxu0  ;;  %v2883_v12 = vpop.f32.mrb[55].mxu1 }
 0x3c3   : > { %v1995_v13 = vpop.f32.mrb[55].mxu0 }
 0x3c4   : > { %v2604_v13 = vpop.permute.xlu1 %2603 }
 0x3c7   : > { %v2162_v14 = vpop.f32.mrb[56].mxu1 }
 0x3c8   : > { %v2170_v15 = vadd.f32 %v2162_v14, %v2039_v1  ;;  %v2121_v16 = vpop.f32.mrb[56].mxu0  ;;  %v2888_v17 = vpop.f32.mrb[57].mxu1 }
 0x3c9   : > { %v2168_v18 = vadd.f32 %v2121_v16, %v2037_v7  ;;  %v2123_v19 = vpop.f32.mrb[57].mxu0  ;;  %v2165_v20 = vpop.f32.mrb[58].mxu1 }
 0x3ca   : > { %v2169_v21 = vadd.f32 %v2123_v19, %v2038_v11  ;;  %v2125_v22 = vpop.f32.mrb[58].mxu0  ;;  %v2889_v23 = vpop.f32.mrb[59].mxu1 }
 0x3cb   : > { %v2126_v24 = vpop.f32.mrb[59].mxu0  ;;  %v2936_v11 = vpop.permute.xlu0 %2935 }
 0x3cc   : > { %v2938_v3 = vunpack.i.h.bf16 %v2936_v11  ;;  %v2937_v12 = vunpack.i.l.bf16 %v2936_v11 }
 0x3ce   : > { %v2606_v16 = vsel %vm729_vm6, %v2937_v12, %v2938_v3  ;;  %v2607_v20 = vsel %vm729_vm6, %v2938_v3, %v2604_v13 }
 0x3cf   : > { %v2293_v25 = vpop.f32.mrb[60].mxu1 }
 0x3d0   : > { %v2301_v26 = vadd.f32 %v2293_v25, %v2170_v15  ;;  %v2252_v27 = vpop.f32.mrb[60].mxu0  ;;  %v2894_v8 = vpop.f32.mrb[61].mxu1 }
 0x3d1   : > { %v2299_v28 = vadd.f32 %v2252_v27, %v2168_v18  ;;  %v2254_v29 = vpop.f32.mrb[61].mxu0  ;;  %v2296_v30 = vpop.f32.mrb[62].mxu1 }
 0x3d2   : > { %v2300_v31 = vadd.f32 %v2254_v29, %v2169_v21  ;;  %v2256_v32 = vpop.f32.mrb[62].mxu0  ;;  %v2895_v33 = vpop.f32.mrb[63].mxu1 }
 0x3d3   : > { %v2257_v4 = vpop.f32.mrb[63].mxu0 }
 0x3d7   : > { %v2424_v34 = vpop.f32.mrb[64].mxu1 }
 0x3d8   : > { %v2432_v6 = vadd.f32 %v2424_v34, %v2301_v26  ;;  %v2383_v35 = vpop.f32.mrb[64].mxu0  ;;  %v2900_v36 = vpop.f32.mrb[65].mxu1 }
 0x3d9   : > { %v2430_v37 = vadd.f32 %v2383_v35, %v2299_v28  ;;  %v2385_v38 = vpop.f32.mrb[65].mxu0  ;;  %v2427_v39 = vpop.f32.mrb[66].mxu1 }
 0x3da   : > { %v2431_v40 = vadd.f32 %v2385_v38, %v2300_v31  ;;  %v2387_v41 = vpop.f32.mrb[66].mxu0  ;;  %v2901_v42 = vpop.f32.mrb[67].mxu1 }
 0x3db   : > { %v2388_v43 = vpop.f32.mrb[67].mxu0 }
 0x3df   : > { %v2555_v44 = vpop.f32.mrb[68].mxu1 }
 0x3e0   : > { %v2563_v46 = vadd.f32 %v2555_v44, %v2432_v6  ;;  %v2514_v47 = vpop.f32.mrb[68].mxu0  ;;  %v2906_v48 = vpop.f32.mrb[69].mxu1 }
 0x3e1   : > { %v2561_v49 = vadd.f32 %v2514_v47, %v2430_v37  ;;  %v2516_v50 = vpop.f32.mrb[69].mxu0  ;;  %v2558_v51 = vpop.f32.mrb[70].mxu1 }
 0x3e2   : > { %v2572_v52 = vadd.f32 %v2568_v45, %v2563_v46  ;;  %v2562_v53 = vadd.f32 %v2516_v50, %v2431_v40  ;;  %v2518_v54 = vpop.f32.mrb[70].mxu0  ;;  %v2907_v55 = vpop.f32.mrb[71].mxu1 }
 0x3e3   : > { %v2570_v56 = vadd.f32 %v2568_v45, %v2561_v49  ;;  %v2519_v57 = vpop.f32.mrb[71].mxu0 }
 0x3e4   : > { %v2575_v58 = vsub.f32 0.0, %v2572_v52  ;;  %v2571_v59 = vadd.f32 %v2568_v45, %v2562_v53 }
 0x3e5   : > { %v2573_v60 = vsub.f32 0.0, %v2570_v56 }
 0x3e6   : > { %v2580_v61 = vmul.f32 1.442695, %v2575_v58  ;;  %v2574_v62 = vsub.f32 0.0, %v2571_v59 }
 0x3e7   : > { %v2576_v63 = vmul.f32 1.442695, %v2573_v60 }
 0x3e8   : > { %2958 = vpow2.f32 %v2580_v61  ;;  %v2578_v0 = vmul.f32 1.442695, %v2574_v62 }
 0x3e9   : > { %2960 = vpow2.f32 %v2576_v63 }
 0x3ea   : > { %2962 = vpow2.f32 %v2578_v0 }
 0x3f2   : > { %v2959_v1 = vpop.eup %2958 }
 0x3f3   : > { %v2961_v2 = vpop.eup %2960  ;;  %v2584_v5 = vadd.f32 1.0, %v2959_v1 }
 0x3f4   : > { %v2963_v7 = vpop.eup %2962  ;;  %v2582_v9 = vadd.f32 1.0, %v2961_v2 }
 0x3f5   : > { %2964 = vrcp.f32 %v2584_v5  ;;  %v2583_v10 = vadd.f32 1.0, %v2963_v7 }
 0x3f6   : > { %2966 = vrcp.f32 %v2582_v9 }
 0x3f7   : > { %2968 = vrcp.f32 %v2583_v10 }
 0x3ff   : > { %v2965_v14 = vpop.eup %2964 }
 0x400   : > { %v2967_v15 = vpop.eup %2966  ;;  %v2593_v17 = vmul.f32 %v2965_v14, %v2572_v52 }
 0x401   : > { %v2969_v18 = vpop.eup %2968  ;;  %v2591_v19 = vmul.f32 %v2967_v15, %v2570_v56 }
 0x402   : > { %v2592_v21 = vmul.f32 %v2969_v18, %v2571_v59  ;;  %v2613_v22 = vadd.f32 %v2604_v13, %v2593_v17 }
 0x403   : > { %v2611_v23 = vadd.f32 %v2606_v16, %v2591_v19 }
 0x404   : > { %v2612_v24 = vadd.f32 %v2607_v20, %v2592_v21  ;;  %2620 = vst.msk [vmem:[%s251_s28 + $0x8] sm:$0xf] %vm2619_vm0, %v2613_v22 }
 0x406   : > { %v2616_v25 = vcombine.low %v2611_v23, %v2612_v24 }
 0x408   : > { %2618 = vst [vmem:[%s251_s28] sm:$0xff] %v2616_v25 }
 0x409 PF: > { %s16_s21 = sadd.s32 1, %s2976_s21  }
 0x40a   : > { %p13_p4 = scmp.ge.s32.totalorder %s16_s21, 4  }
 0x40c   :  { %15 = sbr.rel (!%p13_p4) target bundleno = 1 (0x1), region = 90 }

</bundles_post_ra>
